<compile_context>
chip_gen: v7x
topology: tpu7x:2x2x1
jax: 0.10.0
libtpu: 0.0.40
codegen_flags: <defaults>
</compile_context>

<pallas_src>
import functools

import jax
import jax.numpy as jnp
from jax.experimental import pallas as pl
from jax.experimental.pallas import tpu as pltpu


def _round_up(x, m):
    return ((x + m - 1) // m) * m


# ---------------------------------------------------------------------------
# Kernel 1: fused dual-direction LightGraphConv layer.
#   For grid point (i, k):
#     acc_c[i]        += A[i,k] @ g_feat[k]            (cell direction, scratch)
#     g_feat_out[k]   += A[i,k]^T @ c_feat[i]          (gene direction, resident out)
#   epilogues:
#     k == last : c_feat_out[i] = acc_c ; c_hid_out[i] = c_hid[i] + w*acc_c
#     i == last : g_hid_out[k]  = g_hid[k] + w*g_feat_out[k]
# Each A tile is read from HBM exactly once per layer.
# ---------------------------------------------------------------------------
def _fused_lgc_kernel(w_ref,
                      a_ref, gfeat_ref, cfeat_ref, chid_ref, ghid_ref,
                      cfeat_out, chid_out, gfeat_out, ghid_out,
                      acc_ref, *, tk):
    i = pl.program_id(0)
    k = pl.program_id(1)
    ni = pl.num_programs(0)
    nk = pl.num_programs(1)
    w = w_ref[0]                                         # SMEM scalar (f32)

    @pl.when(k == 0)
    def _():
        acc_ref[...] = jnp.zeros_like(acc_ref)

    a = a_ref[...]                                       # (tm, tk) f32
    ks = pl.ds(pl.multiple_of(k * tk, tk), tk)

    # cell <- gene direction (MXU, f32 accumulation)
    acc_ref[...] += jnp.dot(a, gfeat_ref[ks, :],
                            preferred_element_type=jnp.float32)

    # gene <- cell direction: contract A tile along its row (cell) axis; no A^T
    # copy is ever materialized in HBM.
    contrib = jax.lax.dot_general(
        a, cfeat_ref[...],
        dimension_numbers=(((0,), (0,)), ((), ())),
        preferred_element_type=jnp.float32)              # (tk, Dp)

    @pl.when(i == 0)
    def _():
        gfeat_out[ks, :] = contrib

    @pl.when(i != 0)
    def _():
        gfeat_out[ks, :] = gfeat_out[ks, :] + contrib

    @pl.when(k == nk - 1)
    def _():
        conv = acc_ref[...]
        cfeat_out[...] = conv
        chid_out[...] = chid_ref[...] + w * conv          # fused axpy (f32)

    @pl.when(i == ni - 1)
    def _():
        ghid_out[ks, :] = ghid_ref[ks, :] + w * gfeat_out[ks, :]


def fused_light_gcn_layer(a_hat, c_feat, g_feat, c_hid, g_hid, w, *, tm, tk):
    """One LightGCN layer for both node types; all dims pre-padded/aligned."""
    Cp, Gp = a_hat.shape
    Dp = c_feat.shape[1]
    assert Cp % tm == 0 and Gp % tk == 0 and Dp % 128 == 0
    grid = (Cp // tm, Gp // tk)
    kernel = functools.partial(_fused_lgc_kernel, tk=tk)
    # NOTE: input_output_aliases for the hidden buffers intentionally omitted;
    # XLA reuses these intermediates across the layer loop anyway.
    return pl.pallas_call(
        kernel,
        out_shape=(
            jax.ShapeDtypeStruct((Cp, Dp), jnp.float32),   # c_feat_new
            jax.ShapeDtypeStruct((Cp, Dp), jnp.float32),   # c_hid_new
            jax.ShapeDtypeStruct((Gp, Dp), jnp.float32),   # g_feat_new
            jax.ShapeDtypeStruct((Gp, Dp), jnp.float32),   # g_hid_new
        ),
        grid_spec=pltpu.PrefetchScalarGridSpec(
            num_scalar_prefetch=1,                          # layer weight in SMEM
            grid=grid,
            in_specs=[
                pl.BlockSpec((tm, tk), lambda i, k, w: (i, k)),   # A_hat tile
                pl.BlockSpec((Gp, Dp), lambda i, k, w: (0, 0)),   # g_feat (resident)
                pl.BlockSpec((tm, Dp), lambda i, k, w: (i, 0)),   # c_feat row tile
                pl.BlockSpec((tm, Dp), lambda i, k, w: (i, 0)),   # c_hidden row tile
                pl.BlockSpec((Gp, Dp), lambda i, k, w: (0, 0)),   # g_hidden (resident)
            ],
            out_specs=(
                pl.BlockSpec((tm, Dp), lambda i, k, w: (i, 0)),
                pl.BlockSpec((tm, Dp), lambda i, k, w: (i, 0)),
                pl.BlockSpec((Gp, Dp), lambda i, k, w: (0, 0)),   # resident output
                pl.BlockSpec((Gp, Dp), lambda i, k, w: (0, 0)),   # resident output
            ),
            scratch_shapes=[pltpu.VMEM((tm, Dp), jnp.float32)],
        ),
        # gene-direction accumulates over i, cell-direction over k -> both axes
        # are reductions for one of the outputs; kernel is HBM-bound anyway.
        compiler_params=pltpu.CompilerParams(
            dimension_semantics=("arbitrary", "arbitrary")),
    )(w, a_hat, g_feat, c_feat, c_hid, g_hid)


# ---------------------------------------------------------------------------
# Kernel 2: per-edge Dot decoder scores  (E, D) x (E, D) -> (E, 1)
# ---------------------------------------------------------------------------
def _edge_score_kernel(c_ref, g_ref, o_ref):
    o_ref[...] = jnp.sum(c_ref[...] * g_ref[...], axis=-1, keepdims=True)


def edge_dot_scores(c_rows, g_rows, *, te):
    E, D = c_rows.shape
    assert E % te == 0 and D % 128 == 0
    out = pl.pallas_call(
        _edge_score_kernel,
        out_shape=jax.ShapeDtypeStruct((E, 1), jnp.float32),
        grid_spec=pltpu.PrefetchScalarGridSpec(
            num_scalar_prefetch=0,
            grid=(E // te,),
            in_specs=[pl.BlockSpec((te, D), lambda i: (i, 0)),
                      pl.BlockSpec((te, D), lambda i: (i, 0))],
            out_specs=pl.BlockSpec((te, 1), lambda i: (i, 0)),
        ),
        compiler_params=pltpu.CompilerParams(dimension_semantics=("parallel",)),
    )(c_rows, g_rows)
    return out[:, 0]


# ---------------------------------------------------------------------------
# scBiG forward (glue in plain JAX, hot path in the Pallas kernels above)
# ---------------------------------------------------------------------------
def scbig_forward(params, A, pos_edges, neg_edges, n_layers=2):
    cell_feature = params["cell_feature"]
    gene_feature = params["gene_feature"]
    weights = params["weights"]

    n_cells, n_genes = A.shape
    D = cell_feature.shape[1]

    # degree^(-1/2) normalizers (zero-degree nodes -> 0); exact for weighted A too
    deg_c = jnp.sum(A, axis=1, keepdims=True)                   # (C, 1)
    deg_g = jnp.sum(A, axis=0, keepdims=True)                   # (1, G)
    dc_inv = jnp.where(deg_c > 0,
                       jax.lax.rsqrt(jnp.where(deg_c > 0, deg_c, 1.0)), 0.0)
    dg_inv = jnp.where(deg_g > 0,
                       jax.lax.rsqrt(jnp.where(deg_g > 0, deg_g, 1.0)), 0.0)

    # pre-normalized adjacency computed ONCE (f32 to match the reference numerics)
    a_hat = (dc_inv * A * dg_inv).astype(jnp.float32)           # (C, G)

    # tile sizes: up to 512x512 f32 A tile (1 MiB per grid step), shrunk for tiny inputs
    tm = min(512, _round_up(n_cells, 8))
    tk = min(512, _round_up(n_genes, 128))
    Cp = _round_up(n_cells, tm)
    Gp = _round_up(n_genes, tk)
    Dp = _round_up(D, 128)

    # pad once to lane/tile-aligned shapes (zero rows/cols are exact no-ops)
    a_hat_p = jnp.pad(a_hat, ((0, Cp - n_cells), (0, Gp - n_genes)))
    c0 = jnp.pad(cell_feature.astype(jnp.float32), ((0, Cp - n_cells), (0, Dp - D)))
    g0 = jnp.pad(gene_feature.astype(jnp.float32), ((0, Gp - n_genes), (0, Dp - D)))

    c_feat, g_feat = c0, g0
    c_hidden = weights[0] * c0
    g_hidden = weights[0] * g0

    # LightGCN layers: both directions consume previous-layer features; each A
    # tile is read from HBM once per layer (fused kernel).
    for l in range(n_layers):
        w_l = weights[l + 1].reshape(1).astype(jnp.float32)
        c_feat, c_hidden, g_feat, g_hidden = fused_light_gcn_layer(
            a_hat_p, c_feat, g_feat, c_hidden, g_hidden, w_l, tm=tm, tk=tk)

    # Dot decoder: per-edge scoring (no dense C x G score matrix)
    def _score(src, dst):
        E = int(src.shape[0])
        if E == 0:
            return jnp.zeros((0,), jnp.float32)
        te = min(512, _round_up(E, 8))
        Ep = _round_up(E, te)
        src_p = jnp.pad(src, (0, Ep - E))
        dst_p = jnp.pad(dst, (0, Ep - E))
        c_rows = c_hidden[src_p]                                # (Ep, Dp) gather is glue
        g_rows = g_hidden[dst_p]
        return edge_dot_scores(c_rows, g_rows, te=te)[:E]

    pos_src, pos_dst = pos_edges
    neg_src, neg_dst = neg_edges
    return _score(pos_src, pos_dst), _score(neg_src, neg_dst)


# ---------------------------------------------------------------------------
# Deterministic parameter / input construction
# ---------------------------------------------------------------------------
def init_params(key, n_cells, n_genes, feats_dim, n_layers=2):
    k1, k2 = jax.random.split(key)
    # xavier_uniform_ on a (rows, cols) matrix: bound = sqrt(6 / (rows + cols))
    b_c = (6.0 / (n_cells + feats_dim)) ** 0.5
    b_g = (6.0 / (n_genes + feats_dim)) ** 0.5
    cell_feature = jax.random.uniform(k1, (n_cells, feats_dim),
                                      jnp.float32, -b_c, b_c)
    gene_feature = jax.random.uniform(k2, (n_genes, feats_dim),
                                      jnp.float32, -b_g, b_g)
    if n_layers == 2:
        weights = jnp.array([1.0, 0.5, 0.5], dtype=jnp.float32)
    else:
        weights = jnp.ones((n_layers + 1,), jnp.float32) / (n_layers + 1)
    return {"cell_feature": cell_feature,
            "gene_feature": gene_feature,
            "weights": weights}


if __name__ == "__main__":
    n_cells, n_genes, feats_dim, n_layers = 64, 32, 16, 2
    n_edges = 16

    key = jax.random.PRNGKey(0)
    k_param, k_adj = jax.random.split(key)

    params = init_params(k_param, n_cells, n_genes, feats_dim, n_layers)

    # deterministic dense bipartite cell-gene adjacency
    A = jax.random.bernoulli(k_adj, 0.3, (n_cells, n_genes)).astype(jnp.float32)

    # deterministic positive / negative edge lists (src=cell idx, dst=gene idx)
    e = jnp.arange(n_edges, dtype=jnp.int32)
    pos_edges = (e % n_cells, (3 * e) % n_genes)
    neg_edges = ((5 * e + 7) % n_cells, (11 * e + 1) % n_genes)

    fwd = jax.jit(functools.partial(scbig_forward, n_layers=n_layers))
    pos_pre, neg_pre = fwd(params, A, pos_edges, neg_edges)
    jax.block_until_ready((pos_pre, neg_pre))

    assert pos_pre.shape == (n_edges,) and neg_pre.shape == (n_edges,)
    assert bool(jnp.all(jnp.isfinite(pos_pre))) and bool(jnp.all(jnp.isfinite(neg_pre)))
    print("KERNEL_OK")
</pallas_src>

<mosaic_0001>
module attributes {stable_mosaic.version = 11 : i64} {
  func.func @_fused_lgc_kernel(%arg0: i32, %arg1: i32, %arg2: memref<1xf32, #tpu.memory_space<smem>>, %arg3: memref<64x128xf32, #tpu.memory_space<vmem>>, %arg4: memref<128x128xf32, #tpu.memory_space<vmem>>, %arg5: memref<64x128xf32, #tpu.memory_space<vmem>>, %arg6: memref<64x128xf32, #tpu.memory_space<vmem>>, %arg7: memref<128x128xf32, #tpu.memory_space<vmem>>, %arg8: memref<64x128xf32, #tpu.memory_space<vmem>>, %arg9: memref<64x128xf32, #tpu.memory_space<vmem>>, %arg10: memref<128x128xf32, #tpu.memory_space<vmem>>, %arg11: memref<128x128xf32, #tpu.memory_space<vmem>>, %arg12: memref<64x128xf32, #tpu.memory_space<vmem>>) attributes {dimension_semantics = [#tpu.dimension_semantics<arbitrary>, #tpu.dimension_semantics<arbitrary>], iteration_bounds = array<i64: 1, 1>, scalar_prefetch = 1 : i64, scratch_operands = 1 : i64, tpu.core_type = #tpu.core_type<tc>, window_params = [{transform_indices = @transform_0, window_bounds = array<i64: 64, 128>}, {pipeline_mode = #tpu.pipeline_mode<synchronous>, transform_indices = @transform_1, window_bounds = array<i64: 128, 128>}, {transform_indices = @transform_2, window_bounds = array<i64: 64, 128>}, {transform_indices = @transform_3, window_bounds = array<i64: 64, 128>}, {pipeline_mode = #tpu.pipeline_mode<synchronous>, transform_indices = @transform_4, window_bounds = array<i64: 128, 128>}, {transform_indices = @transform_5, window_bounds = array<i64: 64, 128>}, {transform_indices = @transform_6, window_bounds = array<i64: 64, 128>}, {pipeline_mode = #tpu.pipeline_mode<synchronous>, transform_indices = @transform_7, window_bounds = array<i64: 128, 128>}, {pipeline_mode = #tpu.pipeline_mode<synchronous>, transform_indices = @transform_8, window_bounds = array<i64: 128, 128>}]} {
    %c0 = arith.constant 0 : index
    %0 = memref.load %arg2[%c0] : memref<1xf32, #tpu.memory_space<smem>>
    %c0_i32 = arith.constant 0 : i32
    %1 = arith.cmpi eq, %arg1, %c0_i32 : i32
    %2 = arith.extui %1 : i1 to i32
    %c0_i32_0 = arith.constant 0 : i32
    %3 = arith.cmpi ne, %2, %c0_i32_0 : i32
    scf.if %3 {
      %cst_19 = arith.constant 0.000000e+00 : f32
      %27 = vector.broadcast %cst_19 : f32 to vector<64x128xf32>
      %c0_20 = arith.constant 0 : index
      %c0_21 = arith.constant 0 : index
      %28 = vector.load %arg12[%c0_20, %c0_21] : memref<64x128xf32, #tpu.memory_space<vmem>>, vector<64x128xf32>
      tpu.vector_store %arg12[%c0_20, %c0_21], %27 {strides = array<i32>} : memref<64x128xf32, #tpu.memory_space<vmem>>, vector<64x128xf32>,
    } else {
    }
    %c0_1 = arith.constant 0 : index
    %c0_2 = arith.constant 0 : index
    %4 = vector.load %arg3[%c0_1, %c0_2] : memref<64x128xf32, #tpu.memory_space<vmem>>, vector<64x128xf32>
    %c128_i32 = arith.constant 128 : i32
    %5 = arith.muli %arg1, %c128_i32 : i32
    %6 = tpu.assume_multiple %5, 128 : i32
    %c0_3 = arith.constant 0 : index
    %c0_4 = arith.constant 0 : index
    %7 = vector.load %arg12[%c0_3, %c0_4] : memref<64x128xf32, #tpu.memory_space<vmem>>, vector<64x128xf32>
    %8 = arith.index_cast %6 : i32 to index
    %c0_5 = arith.constant 0 : index
    %9 = vector.load %arg4[%8, %c0_5] : memref<128x128xf32, #tpu.memory_space<vmem>>, vector<128x128xf32>
    %cst = arith.constant dense<0.000000e+00> : vector<64x128xf32>
    %10 = tpu.matmul %4, %9, %cst {dimension_numbers = #tpu.dot_dimension_numbers<[1], [0], [0], [1], [0, 0, 1, 1], [], []>} : vector<64x128xf32>, vector<128x128xf32>, vector<64x128xf32> -> vector<64x128xf32>
    %11 = arith.addf %7, %10 : vector<64x128xf32>
    %c0_6 = arith.constant 0 : index
    %c0_7 = arith.constant 0 : index
    %12 = vector.load %arg12[%c0_6, %c0_7] : memref<64x128xf32, #tpu.memory_space<vmem>>, vector<64x128xf32>
    tpu.vector_store %arg12[%c0_6, %c0_7], %11 {strides = array<i32>} : memref<64x128xf32, #tpu.memory_space<vmem>>, vector<64x128xf32>,
    %c0_8 = arith.constant 0 : index
    %c0_9 = arith.constant 0 : index
    %13 = vector.load %arg5[%c0_8, %c0_9] : memref<64x128xf32, #tpu.memory_space<vmem>>, vector<64x128xf32>
    %cst_10 = arith.constant dense<0.000000e+00> : vector<128x128xf32>
    %14 = tpu.matmul %4, %13, %cst_10 {dimension_numbers = #tpu.dot_dimension_numbers<[0], [0], [1], [1], [0, 1, 1, 1], [], []>} : vector<64x128xf32>, vector<64x128xf32>, vector<128x128xf32> -> vector<128x128xf32>
    %c0_i32_11 = arith.constant 0 : i32
    %15 = arith.cmpi eq, %arg0, %c0_i32_11 : i32
    %16 = arith.extui %15 : i1 to i32
    %c0_i32_12 = arith.constant 0 : i32
    %17 = arith.cmpi ne, %16, %c0_i32_12 : i32
    scf.if %17 {
      %27 = arith.index_cast %6 : i32 to index
      %c0_19 = arith.constant 0 : index
      %28 = vector.load %arg10[%27, %c0_19] : memref<128x128xf32, #tpu.memory_space<vmem>>, vector<128x128xf32>
      tpu.vector_store %arg10[%27, %c0_19], %14 {strides = array<i32>} : memref<128x128xf32, #tpu.memory_space<vmem>>, vector<128x128xf32>,
    } else {
    }
    %c0_i32_13 = arith.constant 0 : i32
    %18 = arith.cmpi ne, %arg0, %c0_i32_13 : i32
    %19 = arith.extui %18 : i1 to i32
    %c0_i32_14 = arith.constant 0 : i32
    %20 = arith.cmpi ne, %19, %c0_i32_14 : i32
    scf.if %20 {
      %27 = arith.index_cast %6 : i32 to index
      %c0_19 = arith.constant 0 : index
      %28 = vector.load %arg10[%27, %c0_19] : memref<128x128xf32, #tpu.memory_space<vmem>>, vector<128x128xf32>
      %29 = arith.addf %28, %14 : vector<128x128xf32>
      %30 = arith.index_cast %6 : i32 to index
      %c0_20 = arith.constant 0 : index
      %31 = vector.load %arg10[%30, %c0_20] : memref<128x128xf32, #tpu.memory_space<vmem>>, vector<128x128xf32>
      tpu.vector_store %arg10[%30, %c0_20], %29 {strides = array<i32>} : memref<128x128xf32, #tpu.memory_space<vmem>>, vector<128x128xf32>,
    } else {
    }
    %c0_i32_15 = arith.constant 0 : i32
    %21 = arith.cmpi eq, %arg1, %c0_i32_15 : i32
    %22 = arith.extui %21 : i1 to i32
    %c0_i32_16 = arith.constant 0 : i32
    %23 = arith.cmpi ne, %22, %c0_i32_16 : i32
    scf.if %23 {
      %c0_19 = arith.constant 0 : index
      %c0_20 = arith.constant 0 : index
      %27 = vector.load %arg12[%c0_19, %c0_20] : memref<64x128xf32, #tpu.memory_space<vmem>>, vector<64x128xf32>
      %c0_21 = arith.constant 0 : index
      %c0_22 = arith.constant 0 : index
      %28 = vector.load %arg8[%c0_21, %c0_22] : memref<64x128xf32, #tpu.memory_space<vmem>>, vector<64x128xf32>
      tpu.vector_store %arg8[%c0_21, %c0_22], %27 {strides = array<i32>} : memref<64x128xf32, #tpu.memory_space<vmem>>, vector<64x128xf32>,
      %c0_23 = arith.constant 0 : index
      %c0_24 = arith.constant 0 : index
      %29 = vector.load %arg6[%c0_23, %c0_24] : memref<64x128xf32, #tpu.memory_space<vmem>>, vector<64x128xf32>
      %30 = vector.broadcast %0 : f32 to vector<64x128xf32>
      %31 = arith.mulf %30, %27 : vector<64x128xf32>
      %32 = arith.addf %29, %31 : vector<64x128xf32>
      %c0_25 = arith.constant 0 : index
      %c0_26 = arith.constant 0 : index
      %33 = vector.load %arg9[%c0_25, %c0_26] : memref<64x128xf32, #tpu.memory_space<vmem>>, vector<64x128xf32>
      tpu.vector_store %arg9[%c0_25, %c0_26], %32 {strides = array<i32>} : memref<64x128xf32, #tpu.memory_space<vmem>>, vector<64x128xf32>,
    } else {
    }
    %c0_i32_17 = arith.constant 0 : i32
    %24 = arith.cmpi eq, %arg0, %c0_i32_17 : i32
    %25 = arith.extui %24 : i1 to i32
    %c0_i32_18 = arith.constant 0 : i32
    %26 = arith.cmpi ne, %25, %c0_i32_18 : i32
    scf.if %26 {
      %27 = arith.index_cast %6 : i32 to index
      %c0_19 = arith.constant 0 : index
      %28 = vector.load %arg7[%27, %c0_19] : memref<128x128xf32, #tpu.memory_space<vmem>>, vector<128x128xf32>
      %29 = arith.index_cast %6 : i32 to index
      %c0_20 = arith.constant 0 : index
      %30 = vector.load %arg10[%29, %c0_20] : memref<128x128xf32, #tpu.memory_space<vmem>>, vector<128x128xf32>
      %31 = vector.broadcast %0 : f32 to vector<128x128xf32>
      %32 = arith.mulf %31, %30 : vector<128x128xf32>
      %33 = arith.addf %28, %32 : vector<128x128xf32>
      %34 = arith.index_cast %6 : i32 to index
      %c0_21 = arith.constant 0 : index
      %35 = vector.load %arg11[%34, %c0_21] : memref<128x128xf32, #tpu.memory_space<vmem>>, vector<128x128xf32>
      tpu.vector_store %arg11[%34, %c0_21], %33 {strides = array<i32>} : memref<128x128xf32, #tpu.memory_space<vmem>>, vector<128x128xf32>,
    } else {
    }
    return
  }
  func.func @transform_0(%arg0: i32, %arg1: i32, %arg2: memref<1xf32, #tpu.memory_space<smem>>) -> (i32, i32) {
    %c0_i32 = arith.constant 0 : i32
    return %arg0, %arg1 : i32, i32
  }
  func.func @transform_1(%arg0: i32, %arg1: i32, %arg2: memref<1xf32, #tpu.memory_space<smem>>) -> (i32, i32) {
    %c0_i32 = arith.constant 0 : i32
    %c0_i32_0 = arith.constant 0 : i32
    %c0_i32_1 = arith.constant 0 : i32
    return %c0_i32, %c0_i32_0 : i32, i32
  }
  func.func @transform_2(%arg0: i32, %arg1: i32, %arg2: memref<1xf32, #tpu.memory_space<smem>>) -> (i32, i32) {
    %c0_i32 = arith.constant 0 : i32
    %c0_i32_0 = arith.constant 0 : i32
    return %arg0, %c0_i32 : i32, i32
  }
  func.func @transform_3(%arg0: i32, %arg1: i32, %arg2: memref<1xf32, #tpu.memory_space<smem>>) -> (i32, i32) {
    %c0_i32 = arith.constant 0 : i32
    %c0_i32_0 = arith.constant 0 : i32
    return %arg0, %c0_i32 : i32, i32
  }
  func.func @transform_4(%arg0: i32, %arg1: i32, %arg2: memref<1xf32, #tpu.memory_space<smem>>) -> (i32, i32) {
    %c0_i32 = arith.constant 0 : i32
    %c0_i32_0 = arith.constant 0 : i32
    %c0_i32_1 = arith.constant 0 : i32
    return %c0_i32, %c0_i32_0 : i32, i32
  }
  func.func @transform_5(%arg0: i32, %arg1: i32, %arg2: memref<1xf32, #tpu.memory_space<smem>>) -> (i32, i32) {
    %c0_i32 = arith.constant 0 : i32
    %c0_i32_0 = arith.constant 0 : i32
    return %arg0, %c0_i32 : i32, i32
  }
  func.func @transform_6(%arg0: i32, %arg1: i32, %arg2: memref<1xf32, #tpu.memory_space<smem>>) -> (i32, i32) {
    %c0_i32 = arith.constant 0 : i32
    %c0_i32_0 = arith.constant 0 : i32
    return %arg0, %c0_i32 : i32, i32
  }
  func.func @transform_7(%arg0: i32, %arg1: i32, %arg2: memref<1xf32, #tpu.memory_space<smem>>) -> (i32, i32) {
    %c0_i32 = arith.constant 0 : i32
    %c0_i32_0 = arith.constant 0 : i32
    %c0_i32_1 = arith.constant 0 : i32
    return %c0_i32, %c0_i32_0 : i32, i32
  }
  func.func @transform_8(%arg0: i32, %arg1: i32, %arg2: memref<1xf32, #tpu.memory_space<smem>>) -> (i32, i32) {
    %c0_i32 = arith.constant 0 : i32
    %c0_i32_0 = arith.constant 0 : i32
    %c0_i32_1 = arith.constant 0 : i32
    return %c0_i32, %c0_i32_0 : i32, i32
  }
}

module attributes {stable_mosaic.version = 11 : i64} {
  func.func @_fused_lgc_kernel(%arg0: i32, %arg1: i32, %arg2: memref<1xf32, #tpu.memory_space<smem>>, %arg3: memref<64x128xf32, #tpu.memory_space<vmem>>, %arg4: memref<128x128xf32, #tpu.memory_space<vmem>>, %arg5: memref<64x128xf32, #tpu.memory_space<vmem>>, %arg6: memref<64x128xf32, #tpu.memory_space<vmem>>, %arg7: memref<128x128xf32, #tpu.memory_space<vmem>>, %arg8: memref<64x128xf32, #tpu.memory_space<vmem>>, %arg9: memref<64x128xf32, #tpu.memory_space<vmem>>, %arg10: memref<128x128xf32, #tpu.memory_space<vmem>>, %arg11: memref<128x128xf32, #tpu.memory_space<vmem>>, %arg12: memref<64x128xf32, #tpu.memory_space<vmem>>) attributes {dimension_semantics = [#tpu.dimension_semantics<arbitrary>, #tpu.dimension_semantics<arbitrary>], iteration_bounds = array<i64: 1, 1>, scalar_prefetch = 1 : i64, scratch_operands = 1 : i64, tpu.core_type = #tpu.core_type<tc>, window_params = [{transform_indices = @transform_0, window_bounds = array<i64: 64, 128>}, {pipeline_mode = #tpu.pipeline_mode<synchronous>, transform_indices = @transform_1, window_bounds = array<i64: 128, 128>}, {transform_indices = @transform_2, window_bounds = array<i64: 64, 128>}, {transform_indices = @transform_3, window_bounds = array<i64: 64, 128>}, {pipeline_mode = #tpu.pipeline_mode<synchronous>, transform_indices = @transform_4, window_bounds = array<i64: 128, 128>}, {transform_indices = @transform_5, window_bounds = array<i64: 64, 128>}, {transform_indices = @transform_6, window_bounds = array<i64: 64, 128>}, {pipeline_mode = #tpu.pipeline_mode<synchronous>, transform_indices = @transform_7, window_bounds = array<i64: 128, 128>}, {pipeline_mode = #tpu.pipeline_mode<synchronous>, transform_indices = @transform_8, window_bounds = array<i64: 128, 128>}]} {
    %c0 = arith.constant 0 : index
    %0 = memref.load %arg2[%c0] : memref<1xf32, #tpu.memory_space<smem>>
    %c0_i32 = arith.constant 0 : i32
    %1 = arith.cmpi eq, %arg1, %c0_i32 : i32
    %2 = arith.extui %1 : i1 to i32
    %c0_i32_0 = arith.constant 0 : i32
    %3 = arith.cmpi ne, %2, %c0_i32_0 : i32
    scf.if %3 {
      %cst_19 = arith.constant 0.000000e+00 : f32
      %27 = vector.broadcast %cst_19 : f32 to vector<64x128xf32>
      %c0_20 = arith.constant 0 : index
      %c0_21 = arith.constant 0 : index
      %28 = vector.load %arg12[%c0_20, %c0_21] : memref<64x128xf32, #tpu.memory_space<vmem>>, vector<64x128xf32>
      tpu.vector_store %arg12[%c0_20, %c0_21], %27 {strides = array<i32>} : memref<64x128xf32, #tpu.memory_space<vmem>>, vector<64x128xf32>,
    } else {
    }
    %c0_1 = arith.constant 0 : index
    %c0_2 = arith.constant 0 : index
    %4 = vector.load %arg3[%c0_1, %c0_2] : memref<64x128xf32, #tpu.memory_space<vmem>>, vector<64x128xf32>
    %c128_i32 = arith.constant 128 : i32
    %5 = arith.muli %arg1, %c128_i32 : i32
    %6 = tpu.assume_multiple %5, 128 : i32
    %c0_3 = arith.constant 0 : index
    %c0_4 = arith.constant 0 : index
    %7 = vector.load %arg12[%c0_3, %c0_4] : memref<64x128xf32, #tpu.memory_space<vmem>>, vector<64x128xf32>
    %8 = arith.index_cast %6 : i32 to index
    %c0_5 = arith.constant 0 : index
    %9 = vector.load %arg4[%8, %c0_5] : memref<128x128xf32, #tpu.memory_space<vmem>>, vector<128x128xf32>
    %cst = arith.constant dense<0.000000e+00> : vector<64x128xf32>
    %10 = tpu.matmul %4, %9, %cst {dimension_numbers = #tpu.dot_dimension_numbers<[1], [0], [0], [1], [0, 0, 1, 1], [], []>} : vector<64x128xf32>, vector<128x128xf32>, vector<64x128xf32> -> vector<64x128xf32>
    %11 = arith.addf %7, %10 : vector<64x128xf32>
    %c0_6 = arith.constant 0 : index
    %c0_7 = arith.constant 0 : index
    %12 = vector.load %arg12[%c0_6, %c0_7] : memref<64x128xf32, #tpu.memory_space<vmem>>, vector<64x128xf32>
    tpu.vector_store %arg12[%c0_6, %c0_7], %11 {strides = array<i32>} : memref<64x128xf32, #tpu.memory_space<vmem>>, vector<64x128xf32>,
    %c0_8 = arith.constant 0 : index
    %c0_9 = arith.constant 0 : index
    %13 = vector.load %arg5[%c0_8, %c0_9] : memref<64x128xf32, #tpu.memory_space<vmem>>, vector<64x128xf32>
    %cst_10 = arith.constant dense<0.000000e+00> : vector<128x128xf32>
    %14 = tpu.matmul %4, %13, %cst_10 {dimension_numbers = #tpu.dot_dimension_numbers<[0], [0], [1], [1], [0, 1, 1, 1], [], []>} : vector<64x128xf32>, vector<64x128xf32>, vector<128x128xf32> -> vector<128x128xf32>
    %c0_i32_11 = arith.constant 0 : i32
    %15 = arith.cmpi eq, %arg0, %c0_i32_11 : i32
    %16 = arith.extui %15 : i1 to i32
    %c0_i32_12 = arith.constant 0 : i32
    %17 = arith.cmpi ne, %16, %c0_i32_12 : i32
    scf.if %17 {
      %27 = arith.index_cast %6 : i32 to index
      %c0_19 = arith.constant 0 : index
      %28 = vector.load %arg10[%27, %c0_19] : memref<128x128xf32, #tpu.memory_space<vmem>>, vector<128x128xf32>
      tpu.vector_store %arg10[%27, %c0_19], %14 {strides = array<i32>} : memref<128x128xf32, #tpu.memory_space<vmem>>, vector<128x128xf32>,
    } else {
    }
    %c0_i32_13 = arith.constant 0 : i32
    %18 = arith.cmpi ne, %arg0, %c0_i32_13 : i32
    %19 = arith.extui %18 : i1 to i32
    %c0_i32_14 = arith.constant 0 : i32
    %20 = arith.cmpi ne, %19, %c0_i32_14 : i32
    scf.if %20 {
      %27 = arith.index_cast %6 : i32 to index
      %c0_19 = arith.constant 0 : index
      %28 = vector.load %arg10[%27, %c0_19] : memref<128x128xf32, #tpu.memory_space<vmem>>, vector<128x128xf32>
      %29 = arith.addf %28, %14 : vector<128x128xf32>
      %30 = arith.index_cast %6 : i32 to index
      %c0_20 = arith.constant 0 : index
      %31 = vector.load %arg10[%30, %c0_20] : memref<128x128xf32, #tpu.memory_space<vmem>>, vector<128x128xf32>
      tpu.vector_store %arg10[%30, %c0_20], %29 {strides = array<i32>} : memref<128x128xf32, #tpu.memory_space<vmem>>, vector<128x128xf32>,
    } else {
    }
    %c0_i32_15 = arith.constant 0 : i32
    %21 = arith.cmpi eq, %arg1, %c0_i32_15 : i32
    %22 = arith.extui %21 : i1 to i32
    %c0_i32_16 = arith.constant 0 : i32
    %23 = arith.cmpi ne, %22, %c0_i32_16 : i32
    scf.if %23 {
      %c0_19 = arith.constant 0 : index
      %c0_20 = arith.constant 0 : index
      %27 = vector.load %arg12[%c0_19, %c0_20] : memref<64x128xf32, #tpu.memory_space<vmem>>, vector<64x128xf32>
      %c0_21 = arith.constant 0 : index
      %c0_22 = arith.constant 0 : index
      %28 = vector.load %arg8[%c0_21, %c0_22] : memref<64x128xf32, #tpu.memory_space<vmem>>, vector<64x128xf32>
      tpu.vector_store %arg8[%c0_21, %c0_22], %27 {strides = array<i32>} : memref<64x128xf32, #tpu.memory_space<vmem>>, vector<64x128xf32>,
      %c0_23 = arith.constant 0 : index
      %c0_24 = arith.constant 0 : index
      %29 = vector.load %arg6[%c0_23, %c0_24] : memref<64x128xf32, #tpu.memory_space<vmem>>, vector<64x128xf32>
      %30 = vector.broadcast %0 : f32 to vector<64x128xf32>
      %31 = arith.mulf %30, %27 : vector<64x128xf32>
      %32 = arith.addf %29, %31 : vector<64x128xf32>
      %c0_25 = arith.constant 0 : index
      %c0_26 = arith.constant 0 : index
      %33 = vector.load %arg9[%c0_25, %c0_26] : memref<64x128xf32, #tpu.memory_space<vmem>>, vector<64x128xf32>
      tpu.vector_store %arg9[%c0_25, %c0_26], %32 {strides = array<i32>} : memref<64x128xf32, #tpu.memory_space<vmem>>, vector<64x128xf32>,
    } else {
    }
    %c0_i32_17 = arith.constant 0 : i32
    %24 = arith.cmpi eq, %arg0, %c0_i32_17 : i32
    %25 = arith.extui %24 : i1 to i32
    %c0_i32_18 = arith.constant 0 : i32
    %26 = arith.cmpi ne, %25, %c0_i32_18 : i32
    scf.if %26 {
      %27 = arith.index_cast %6 : i32 to index
      %c0_19 = arith.constant 0 : index
      %28 = vector.load %arg7[%27, %c0_19] : memref<128x128xf32, #tpu.memory_space<vmem>>, vector<128x128xf32>
      %29 = arith.index_cast %6 : i32 to index
      %c0_20 = arith.constant 0 : index
      %30 = vector.load %arg10[%29, %c0_20] : memref<128x128xf32, #tpu.memory_space<vmem>>, vector<128x128xf32>
      %31 = vector.broadcast %0 : f32 to vector<128x128xf32>
      %32 = arith.mulf %31, %30 : vector<128x128xf32>
      %33 = arith.addf %28, %32 : vector<128x128xf32>
      %34 = arith.index_cast %6 : i32 to index
      %c0_21 = arith.constant 0 : index
      %35 = vector.load %arg11[%34, %c0_21] : memref<128x128xf32, #tpu.memory_space<vmem>>, vector<128x128xf32>
      tpu.vector_store %arg11[%34, %c0_21], %33 {strides = array<i32>} : memref<128x128xf32, #tpu.memory_space<vmem>>, vector<128x128xf32>,
    } else {
    }
    return
  }
  func.func @transform_0(%arg0: i32, %arg1: i32, %arg2: memref<1xf32, #tpu.memory_space<smem>>) -> (i32, i32) {
    %c0_i32 = arith.constant 0 : i32
    return %arg0, %arg1 : i32, i32
  }
  func.func @transform_1(%arg0: i32, %arg1: i32, %arg2: memref<1xf32, #tpu.memory_space<smem>>) -> (i32, i32) {
    %c0_i32 = arith.constant 0 : i32
    %c0_i32_0 = arith.constant 0 : i32
    %c0_i32_1 = arith.constant 0 : i32
    return %c0_i32, %c0_i32_0 : i32, i32
  }
  func.func @transform_2(%arg0: i32, %arg1: i32, %arg2: memref<1xf32, #tpu.memory_space<smem>>) -> (i32, i32) {
    %c0_i32 = arith.constant 0 : i32
    %c0_i32_0 = arith.constant 0 : i32
    return %arg0, %c0_i32 : i32, i32
  }
  func.func @transform_3(%arg0: i32, %arg1: i32, %arg2: memref<1xf32, #tpu.memory_space<smem>>) -> (i32, i32) {
    %c0_i32 = arith.constant 0 : i32
    %c0_i32_0 = arith.constant 0 : i32
    return %arg0, %c0_i32 : i32, i32
  }
  func.func @transform_4(%arg0: i32, %arg1: i32, %arg2: memref<1xf32, #tpu.memory_space<smem>>) -> (i32, i32) {
    %c0_i32 = arith.constant 0 : i32
    %c0_i32_0 = arith.constant 0 : i32
    %c0_i32_1 = arith.constant 0 : i32
    return %c0_i32, %c0_i32_0 : i32, i32
  }
  func.func @transform_5(%arg0: i32, %arg1: i32, %arg2: memref<1xf32, #tpu.memory_space<smem>>) -> (i32, i32) {
    %c0_i32 = arith.constant 0 : i32
    %c0_i32_0 = arith.constant 0 : i32
    return %arg0, %c0_i32 : i32, i32
  }
  func.func @transform_6(%arg0: i32, %arg1: i32, %arg2: memref<1xf32, #tpu.memory_space<smem>>) -> (i32, i32) {
    %c0_i32 = arith.constant 0 : i32
    %c0_i32_0 = arith.constant 0 : i32
    return %arg0, %c0_i32 : i32, i32
  }
  func.func @transform_7(%arg0: i32, %arg1: i32, %arg2: memref<1xf32, #tpu.memory_space<smem>>) -> (i32, i32) {
    %c0_i32 = arith.constant 0 : i32
    %c0_i32_0 = arith.constant 0 : i32
    %c0_i32_1 = arith.constant 0 : i32
    return %c0_i32, %c0_i32_0 : i32, i32
  }
  func.func @transform_8(%arg0: i32, %arg1: i32, %arg2: memref<1xf32, #tpu.memory_space<smem>>) -> (i32, i32) {
    %c0_i32 = arith.constant 0 : i32
    %c0_i32_0 = arith.constant 0 : i32
    %c0_i32_1 = arith.constant 0 : i32
    return %c0_i32, %c0_i32_0 : i32, i32
  }
}

module attributes {stable_mosaic.version = 11 : i64} {
  func.func @_edge_score_kernel(%arg0: i32, %arg1: memref<16x128xf32, #tpu.memory_space<vmem>>, %arg2: memref<16x128xf32, #tpu.memory_space<vmem>>, %arg3: memref<16x1xf32, #tpu.memory_space<vmem>>) attributes {dimension_semantics = [#tpu.dimension_semantics<parallel>], iteration_bounds = array<i64: 1>, scalar_prefetch = 0 : i64, scratch_operands = 0 : i64, tpu.core_type = #tpu.core_type<tc>, window_params = [{transform_indices = @transform_0, window_bounds = array<i64: 16, 128>}, {transform_indices = @transform_1, window_bounds = array<i64: 16, 128>}, {transform_indices = @transform_2, window_bounds = array<i64: 16, 1>}]} {
    %c0 = arith.constant 0 : index
    %c0_0 = arith.constant 0 : index
    %0 = vector.load %arg1[%c0, %c0_0] : memref<16x128xf32, #tpu.memory_space<vmem>>, vector<16x128xf32>
    %c0_1 = arith.constant 0 : index
    %c0_2 = arith.constant 0 : index
    %1 = vector.load %arg2[%c0_1, %c0_2] : memref<16x128xf32, #tpu.memory_space<vmem>>, vector<16x128xf32>
    %2 = arith.mulf %0, %1 : vector<16x128xf32>
    %cst = arith.constant dense<0.000000e+00> : vector<16xf32>
    %3 = vector.multi_reduction <add>, %2, %cst [1] : vector<16x128xf32> to vector<16xf32>
    %4 = vector.shape_cast %3 : vector<16xf32> to vector<16x1xf32>
    %c0_3 = arith.constant 0 : index
    %c0_4 = arith.constant 0 : index
    %5 = vector.load %arg3[%c0_3, %c0_4] : memref<16x1xf32, #tpu.memory_space<vmem>>, vector<16x1xf32>
    tpu.vector_store %arg3[%c0_3, %c0_4], %4 {strides = array<i32>} : memref<16x1xf32, #tpu.memory_space<vmem>>, vector<16x1xf32>,
    return
  }
  func.func @transform_0(%arg0: i32) -> (i32, i32) {
    %c0_i32 = arith.constant 0 : i32
    %c0_i32_0 = arith.constant 0 : i32
    return %arg0, %c0_i32 : i32, i32
  }
  func.func @transform_1(%arg0: i32) -> (i32, i32) {
    %c0_i32 = arith.constant 0 : i32
    %c0_i32_0 = arith.constant 0 : i32
    return %arg0, %c0_i32 : i32, i32
  }
  func.func @transform_2(%arg0: i32) -> (i32, i32) {
    %c0_i32 = arith.constant 0 : i32
    %c0_i32_0 = arith.constant 0 : i32
    return %arg0, %c0_i32 : i32, i32
  }
}

</mosaic_0001>

<bundles_post_ra>
// kernel: scbig_forward.6
= control target key start
LH: loop header
LB: loop body
LE: loop exit
PB: predicated region body
PF: predicated region fallthrough
CT: control target
= control target key end

     0   :  { %vm21_vm0 = vcmask 7168   ;;  %s61_s0 = inlined_call_operand.vmem [shape: f32[16,128], index: 0, kind: input, shape index: {}]   ;;  %s62_s1 = inlined_call_operand.vmem [shape: f32[16,128], index: 1, kind: input, shape index: {}]   ;;  %s63_s2 = inlined_call_operand.vmem [shape: f32[16,1], index: 2, kind: output, shape index: {}]  }
   0x1   :  { %v11_v0 = vld [vmem:[%s61_s0] sm:$0xff]  ;;  %v12_v2 = vld [vmem:[%s61_s0 + $0x8] sm:$0xff] }
   0x2   :  { %v13_v1 = vld [vmem:[%s62_s1] sm:$0xff]  ;;  %v14_v4 = vld [vmem:[%s62_s1 + $0x8] sm:$0xff] }
   0x3   :  { %v15_v3 = vmul.f32 %v13_v1, %v11_v0  ;;  %v16_v5 = vmul.f32 %v14_v4, %v12_v2 }
   0x5   :  { %17 = vadd.xlane.f32.xlu0 %v15_v3 }
   0x9   :  { %19 = vadd.xlane.f32.xlu0 %v16_v5 }
  0x92   :  { %v18_v6 = vpop.xlane.xlu0 %17 }
  0x93   :  { %22 = vst.msk [vmem:[%s63_s2] sm:$0xff] %vm21_vm0, %v18_v6 }
  0x96   :  { %v20_v7 = vpop.xlane.xlu0 %19 }
  0x97   :  { %23 = vst.msk [vmem:[%s63_s2 + $0x8] sm:$0xff] %vm21_vm0, %v20_v7 }

// kernel: scbig_forward.4
= control target key start
LH: loop header
LB: loop body
LE: loop exit
PB: predicated region body
PF: predicated region fallthrough
CT: control target
= control target key end

     0   :  { %vm234_vm0 = vcmask 523264   ;;  %s1269_s1 = inlined_call_operand.vmem [shape: f32[64,128], index: 1, kind: input, shape index: {}]   ;;  %s1270_s3 = inlined_call_operand.vmem [shape: f32[64,128], index: 3, kind: input, shape index: {}]   ;;  %s1271_s2 = inlined_call_operand.vmem [shape: f32[128,128], index: 2, kind: input, shape index: {}]   ;;  %s1272_s0 = inlined_call_operand.<no memory space> [shape: f32[1], index: 0, kind: input, shape index: {}]   ;;  %s1273_s6 = inlined_call_operand.vmem [shape: f32[64,128], index: 6, kind: output, shape index: {0}]   ;;  %s1274_s4 = inlined_call_operand.vmem [shape: f32[64,128], index: 4, kind: input, shape index: {}]   ;;  %s1275_s7 = inlined_call_operand.vmem [shape: f32[64,128], index: 7, kind: output, shape index: {1}]   ;;  %s1276_s5 = inlined_call_operand.vmem [shape: f32[128,128], index: 5, kind: input, shape index: {}]   ;;  %s1277_s8 = inlined_call_operand.vmem [shape: f32[128,128], index: 8, kind: output, shape index: {2}]   ;;  %s1278_s9 = inlined_call_operand.vmem [shape: f32[128,128], index: 9, kind: output, shape index: {3}]  }
   0x1   :  { %v39_v0 = vld [vmem:[%s1269_s1] sm:$0xff]  ;;  %v910_v1 = vld [vmem:[%s1269_s1 + $0x8] sm:$0xff]  ;;  %v196_v4 = vld [vmem:[%s1270_s3 + $0x10] sm:$0xff]  ;;  %v1027_v61 = vstv %s1272_s0 }
   0x2   :  { %202 = vxpose.xlu0.b32.start [1/8] (short) %v39_v0, 128  ;;  %753 = vmatprep.mubr.f32.mxu0 %v39_v0  ;;  %v194_v2 = vld [vmem:[%s1270_s3] sm:$0xff]  ;;  %v195_v3 = vld [vmem:[%s1270_s3 + $0x8] sm:$0xff]  ;;  %v197_v5 = vld [vmem:[%s1270_s3 + $0x18] sm:$0xff] }
   0x3   :  { %v837_v6 = vpack.c.bf16 %v195_v3, %v194_v2  ;;  %v841_v7 = vpack.c.bf16 %v197_v5, %v196_v4  ;;  %v198_v8 = vld [vmem:[%s1270_s3 + $0x20] sm:$0xff]  ;;  %v199_v9 = vld [vmem:[%s1270_s3 + $0x28] sm:$0xff]  ;;  %v934_v10 = vld [vmem:[%s1269_s1 + $0x10] sm:$0xff] }
   0x4   :  { %v845_v11 = vpack.c.bf16 %v199_v9, %v198_v8  ;;  %v200_v12 = vld [vmem:[%s1270_s3 + $0x30] sm:$0xff]  ;;  %v201_v13 = vld [vmem:[%s1270_s3 + $0x38] sm:$0xff]  ;;  %v43_v16 = vld [vmem:[%s1269_s1 + $0x20] sm:$0xff] }
   0x5   :  { %838 = vmatprep.subr.bf16.mxu1 %v837_v6  ;;  %v42_v14 = vld [vmem:[%s1269_s1 + $0x18] sm:$0xff]  ;;  %v849_v15 = vpack.c.bf16 %v201_v13, %v200_v12  ;;  %v57_v17 = vld [vmem:[%s1271_s2] sm:$0xff]  ;;  %v58_v18 = vld [vmem:[%s1271_s2 + $0x8] sm:$0xff] }
   0x6   :  { %203 = vxpose.xlu0.b32.cont [2/8] (short) %v910_v1, 128  ;;  %840 = vmatpush3.bf16.msra.mxu1 %v837_v6  ;;  %v805_v19 = vpack.c.bf16 %v58_v18, %v57_v17  ;;  %v44_v20 = vld [vmem:[%s1269_s1 + $0x28] sm:$0xff]  ;;  %v59_v21 = vld [vmem:[%s1271_s2 + $0x10] sm:$0xff]  ;;  %v60_v22 = vld [vmem:[%s1271_s2 + $0x18] sm:$0xff] }
   0x7   :  { %842 = vmatprep.subr.bf16.mxu1 %v841_v7  ;;  %v809_v23 = vpack.c.bf16 %v60_v22, %v59_v21  ;;  %v45_v24 = vld [vmem:[%s1269_s1 + $0x30] sm:$0xff]  ;;  %v61_v25 = vld [vmem:[%s1271_s2 + $0x20] sm:$0xff]  ;;  %v62_v26 = vld [vmem:[%s1271_s2 + $0x28] sm:$0xff] }
   0x8   :  { %806 = vmatprep.subr.bf16.mxu0 %v805_v19  ;;  %v813_v27 = vpack.c.bf16 %v62_v26, %v61_v25  ;;  %v46_v28 = vld [vmem:[%s1269_s1 + $0x38] sm:$0xff]  ;;  %v63_v29 = vld [vmem:[%s1271_s2 + $0x30] sm:$0xff]  ;;  %v65_v32 = vld [vmem:[%s1271_s2 + $0x40] sm:$0xff] }
   0x9   :  { %808 = vmatpush3.bf16.msra.mxu0 %v805_v19  ;;  %v64_v30 = vld [vmem:[%s1271_s2 + $0x38] sm:$0xff]  ;;  %v66_v33 = vld [vmem:[%s1271_s2 + $0x48] sm:$0xff]  ;;  %v67_v35 = vld [vmem:[%s1271_s2 + $0x50] sm:$0xff] }
   0xa   :  { %204 = vxpose.xlu0.b32.cont [3/8] (short) %v934_v10, 128  ;;  %844 = vmatpush3.bf16.msra.mxu1 %v841_v7  ;;  %v817_v31 = vpack.c.bf16 %v64_v30, %v63_v29  ;;  %v821_v34 = vpack.c.bf16 %v66_v33, %v65_v32  ;;  %v68_v36 = vld [vmem:[%s1271_s2 + $0x58] sm:$0xff]  ;;  %v69_v38 = vld [vmem:[%s1271_s2 + $0x60] sm:$0xff]  ;;  %v70_v39 = vld [vmem:[%s1271_s2 + $0x68] sm:$0xff] }
   0xb   :  { %846 = vmatprep.subr.bf16.mxu1 %v845_v11  ;;  %810 = vmatprep.subr.bf16.mxu0 %v809_v23  ;;  %v825_v37 = vpack.c.bf16 %v68_v36, %v67_v35  ;;  %v829_v40 = vpack.c.bf16 %v70_v39, %v69_v38  ;;  %v71_v41 = vld [vmem:[%s1271_s2 + $0x70] sm:$0xff]  ;;  %v72_v42 = vld [vmem:[%s1271_s2 + $0x78] sm:$0xff]  ;;  %v521_v2 = vld [vmem:[%s1274_s4] sm:$0xff] }
   0xc   :  { %v833_v43 = vpack.c.bf16 %v72_v42, %v71_v41  ;;  %v524_v9 = vld [vmem:[%s1274_s4 + $0x18] sm:$0xff]  ;;  %v526_v17 = vld [vmem:[%s1274_s4 + $0x28] sm:$0xff]  ;;  %v525_v18 = vld [vmem:[%s1274_s4 + $0x20] sm:$0xff] }
   0xd   :  { %812 = vmatpush3.bf16.msra.mxu0 %v809_v23  ;;  %v528_v25 = vld [vmem:[%s1274_s4 + $0x38] sm:$0xff]  ;;  %v527_v26 = vld [vmem:[%s1274_s4 + $0x30] sm:$0xff]  ;;  %v559_v30 = vld [vmem:[%s1276_s5 + $0x8] sm:$0xff] }
   0xe   :  { %205 = vxpose.xlu0.b32.cont [4/8] (short) %v42_v14, 128  ;;  %848 = vmatpush3.bf16.msra.mxu1 %v845_v11  ;;  %v558_v33 = vld [vmem:[%s1276_s5] sm:$0xff]  ;;  %v561_v38 = vld [vmem:[%s1276_s5 + $0x18] sm:$0xff]  ;;  %v560_v41 = vld [vmem:[%s1276_s5 + $0x10] sm:$0xff] }
   0xf   :  { %850 = vmatprep.subr.bf16.mxu1 %v849_v15  ;;  %814 = vmatprep.subr.bf16.mxu0 %v813_v27 }
  0x11   :  { %816 = vmatpush3.bf16.msra.mxu0 %v813_v27 }
  0x12   :  { %206 = vxpose.xlu0.b32.cont [5/8] (short) %v43_v16, 128  ;;  %852 = vmatpush3.bf16.msra.mxu1 %v849_v15 }
  0x13   :  { %818 = vmatprep.subr.bf16.mxu0 %v817_v31 }
  0x15   :  { %820 = vmatpush3.bf16.msra.mxu0 %v817_v31 }
  0x16   :  { %207 = vxpose.xlu0.b32.cont [6/8] (short) %v44_v20, 128  ;;  %822 = vmatprep.subr.bf16.mxu0 %v821_v34 }
  0x19   :  { %824 = vmatpush3.bf16.msra.mxu0 %v821_v34 }
  0x1a   :  { %208 = vxpose.xlu0.b32.cont [7/8] (short) %v45_v24, 128  ;;  %826 = vmatprep.subr.bf16.mxu0 %v825_v37 }
  0x1d   :  { %828 = vmatpush3.bf16.msra.mxu0 %v825_v37 }
  0x1e   :  { %209 = vxpose.xlu0.b32.end [8/8] (short) %v46_v28, 128  ;;  %830 = vmatprep.subr.bf16.mxu0 %v829_v40 }
  0x21   :  { %832 = vmatpush3.bf16.msra.mxu0 %v829_v40 }
  0x22   :  { %834 = vmatprep.subr.bf16.mxu0 %v833_v43 }
  0x25   :  { %836 = vmatpush3.bf16.msra.mxu0 %v833_v43 }
  0x28   :  { %754 = vmatmul.mubr.f32.vlgmr.msra.gmra.mrb[0].mxu0 %v910_v1  ;;  %v522_v1 = vld [vmem:[%s1274_s4 + $0x8] sm:$0xff] }
  0x29   :  { %756 = vmatprep.mubr.f32.mxu0 %v934_v10  ;;  %v523_v10 = vld [vmem:[%s1274_s4 + $0x10] sm:$0xff] }
  0x2c   :  { %757 = vmatmul.mubr.f32.gmra.mrb[2].mxu0 %v42_v14 }
  0x2d   :  { %759 = vmatprep.mubr.f32.mxu0 %v43_v16 }
  0x30   :  { %760 = vmatmul.mubr.f32.gmra.mrb[4].mxu0 %v44_v20 }
  0x31   :  { %762 = vmatprep.mubr.f32.mxu0 %v45_v24 }
  0x34   :  { %763 = vmatmul.mubr.f32.gmra.mrb[6].mxu0 %v46_v28 }
  0x82   :  { %v218_v44 = vpop.trf.xlu0 }
  0x83   :  { %781 = vmatprep.mubr.msk.f32.mxu1 %vm234_vm0, %v218_v44 }
  0x86   :  { %v219_v45 = vpop.trf.xlu0 }
  0x87   :  { %782 = vmatmul.mubr.msk.f32.vlgmr.msra.gmra.mrb[0].mxu1 %vm234_vm0, %v219_v45 }
  0x8a   :  { %v220_v46 = vpop.trf.xlu0 }
  0x8b   :  { %784 = vmatprep.mubr.msk.f32.mxu1 %vm234_vm0, %v220_v46  ;;  %v563_v46 = vld [vmem:[%s1276_s5 + $0x28] sm:$0xff] }
  0x8e   :  { %v221_v47 = vpop.trf.xlu0 }
  0x8f   :  { %785 = vmatmul.mubr.msk.f32.gmra.mrb[2].mxu1 %vm234_vm0, %v221_v47 }
  0x92   :  { %v222_v48 = vpop.trf.xlu0 }
  0x93   :  { %787 = vmatprep.mubr.msk.f32.mxu1 %vm234_vm0, %v222_v48 }
  0x96   :  { %v223_v49 = vpop.trf.xlu0 }
  0x97   :  { %788 = vmatmul.mubr.msk.f32.gmra.mrb[4].mxu1 %vm234_vm0, %v223_v49  ;;  %v562_v49 = vld [vmem:[%s1276_s5 + $0x20] sm:$0xff] }
  0x9a   :  { %v224_v50 = vpop.trf.xlu0 }
  0x9b   :  { %790 = vmatprep.mubr.msk.f32.mxu1 %vm234_vm0, %v224_v50 }
  0x9e   :  { %v225_v51 = vpop.trf.xlu0 }
  0x9f   :  { %791 = vmatmul.mubr.msk.f32.gmra.mrb[6].mxu1 %vm234_vm0, %v225_v51 }
  0xa2   :  { %v226_v52 = vpop.trf.xlu0 }
  0xa3   :  { %793 = vmatprep.mubr.msk.f32.mxu1 %vm234_vm0, %v226_v52 }
  0xa6   :  { %v227_v53 = vpop.trf.xlu0 }
  0xa7   :  { %794 = vmatmul.mubr.msk.f32.gmra.mrb[8].mxu1 %vm234_vm0, %v227_v53 }
  0xaa   :  { %v228_v54 = vpop.trf.xlu0 }
  0xab   :  { %796 = vmatprep.mubr.msk.f32.mxu1 %vm234_vm0, %v228_v54  ;;  %v565_v54 = vld [vmem:[%s1276_s5 + $0x38] sm:$0xff] }
  0xae   :  { %v229_v55 = vpop.trf.xlu0 }
  0xaf   :  { %797 = vmatmul.mubr.msk.f32.gmra.mrb[10].mxu1 %vm234_vm0, %v229_v55 }
  0xb2   :  { %v230_v56 = vpop.trf.xlu0 }
  0xb3   :  { %799 = vmatprep.mubr.msk.f32.mxu1 %vm234_vm0, %v230_v56 }
  0xb6   :  { %v231_v57 = vpop.trf.xlu0 }
  0xb7   :  { %800 = vmatmul.mubr.msk.f32.gmra.mrb[12].mxu1 %vm234_vm0, %v231_v57  ;;  %v564_v57 = vld [vmem:[%s1276_s5 + $0x30] sm:$0xff] }
  0xba   :  { %v232_v58 = vpop.trf.xlu0 }
  0xbb   :  { %802 = vmatprep.mubr.msk.f32.mxu1 %vm234_vm0, %v232_v58 }
  0xbe   :  { %v233_v59 = vpop.trf.xlu0 }
  0xbf   :  { %803 = vmatmul.mubr.msk.f32.gmra.mrb[14].mxu1 %vm234_vm0, %v233_v59 }
  0xfb   :  { %v755_v60 = vpop.f32.mrb[0].mxu0 }
  0xfc   :  { %v139_v62 = vpop.f32.mrb[1].mxu0  ;;  %514 = vst [vmem:[%s1273_s6 + $0x8] sm:$0xff] %v755_v60  ;;  %v531_v63 = vmul.f32 %v755_v60, %v1027_v61 }
  0xfd   :  { %513 = vst [vmem:[%s1273_s6] sm:$0xff] %v139_v62  ;;  %v530_v0 = vmul.f32 %v1027_v61, %v139_v62 }
  0xfe   :  { %v539_v3 = vadd.f32 %v531_v63, %v522_v1  ;;  %v567_v63 = vld [vmem:[%s1276_s5 + $0x48] sm:$0xff] }
  0xff   :  { %v538_v4 = vadd.f32 %v530_v0, %v521_v2  ;;  %v758_v5 = vpop.f32.mrb[2].mxu0  ;;  %v566_v2 = vld [vmem:[%s1276_s5 + $0x40] sm:$0xff] }
 0x100   :  { %516 = vst [vmem:[%s1273_s6 + $0x18] sm:$0xff] %v758_v5  ;;  %v149_v6 = vpop.f32.mrb[3].mxu0  ;;  %547 = vst [vmem:[%s1275_s7 + $0x8] sm:$0xff] %v539_v3  ;;  %v533_v7 = vmul.f32 %v758_v5, %v1027_v61 }
 0x101   :  { %546 = vst [vmem:[%s1275_s7] sm:$0xff] %v538_v4  ;;  %515 = vst [vmem:[%s1273_s6 + $0x10] sm:$0xff] %v149_v6  ;;  %v532_v8 = vmul.f32 %v1027_v61, %v149_v6 }
 0x102   :  { %v541_v11 = vadd.f32 %v533_v7, %v524_v9  ;;  %v569_v7 = vld [vmem:[%s1276_s5 + $0x58] sm:$0xff] }
 0x103   :  { %v540_v12 = vadd.f32 %v532_v8, %v523_v10  ;;  %v761_v13 = vpop.f32.mrb[4].mxu0  ;;  %v568_v10 = vld [vmem:[%s1276_s5 + $0x50] sm:$0xff] }
 0x104   :  { %518 = vst [vmem:[%s1273_s6 + $0x28] sm:$0xff] %v761_v13  ;;  %v159_v14 = vpop.f32.mrb[5].mxu0  ;;  %549 = vst [vmem:[%s1275_s7 + $0x18] sm:$0xff] %v541_v11  ;;  %v535_v15 = vmul.f32 %v761_v13, %v1027_v61 }
 0x105   :  { %548 = vst [vmem:[%s1275_s7 + $0x10] sm:$0xff] %v540_v12  ;;  %517 = vst [vmem:[%s1273_s6 + $0x20] sm:$0xff] %v159_v14  ;;  %v534_v16 = vmul.f32 %v1027_v61, %v159_v14 }
 0x106   :  { %v543_v19 = vadd.f32 %v535_v15, %v526_v17  ;;  %v571_v15 = vld [vmem:[%s1276_s5 + $0x68] sm:$0xff] }
 0x107   :  { %v542_v20 = vadd.f32 %v534_v16, %v525_v18  ;;  %v764_v21 = vpop.f32.mrb[6].mxu0  ;;  %v570_v18 = vld [vmem:[%s1276_s5 + $0x60] sm:$0xff] }
 0x108   :  { %520 = vst [vmem:[%s1273_s6 + $0x38] sm:$0xff] %v764_v21  ;;  %v169_v22 = vpop.f32.mrb[7].mxu0  ;;  %551 = vst [vmem:[%s1275_s7 + $0x28] sm:$0xff] %v543_v19  ;;  %v537_v23 = vmul.f32 %v764_v21, %v1027_v61 }
 0x109   :  { %550 = vst [vmem:[%s1275_s7 + $0x20] sm:$0xff] %v542_v20  ;;  %519 = vst [vmem:[%s1273_s6 + $0x30] sm:$0xff] %v169_v22  ;;  %v536_v24 = vmul.f32 %v1027_v61, %v169_v22 }
 0x10a   :  { %v545_v27 = vadd.f32 %v537_v23, %v528_v25  ;;  %v573_v23 = vld [vmem:[%s1276_s5 + $0x78] sm:$0xff] }
 0x10b   :  { %v544_v28 = vadd.f32 %v536_v24, %v527_v26  ;;  %v572_v26 = vld [vmem:[%s1276_s5 + $0x70] sm:$0xff] }
 0x10c   :  { %553 = vst [vmem:[%s1275_s7 + $0x38] sm:$0xff] %v545_v27 }
 0x10d   :  { %552 = vst [vmem:[%s1275_s7 + $0x30] sm:$0xff] %v544_v28 }
 0x15a   :  { %v783_v29 = vpop.f32.mrb[0].mxu1 }
 0x15b   :  { %434 = vst [vmem:[%s1277_s8 + $0x8] sm:$0xff] %v783_v29  ;;  %v593_v31 = vmul.f32 %v783_v29, %v1027_v61  ;;  %v349_v32 = vpop.f32.mrb[1].mxu1 }
 0x15c   :  { %433 = vst [vmem:[%s1277_s8] sm:$0xff] %v349_v32  ;;  %v592_v34 = vmul.f32 %v1027_v61, %v349_v32 }
 0x15d   :  { %v609_v35 = vadd.f32 %v593_v31, %v559_v30 }
 0x15e   :  { %v608_v36 = vadd.f32 %v592_v34, %v558_v33 }
 0x15f   :  { %626 = vst [vmem:[%s1278_s9 + $0x8] sm:$0xff] %v609_v35 }
 0x160   :  { %625 = vst [vmem:[%s1278_s9] sm:$0xff] %v608_v36 }
 0x162   :  { %v786_v37 = vpop.f32.mrb[2].mxu1 }
 0x163   :  { %436 = vst [vmem:[%s1277_s8 + $0x18] sm:$0xff] %v786_v37  ;;  %v595_v39 = vmul.f32 %v786_v37, %v1027_v61  ;;  %v359_v40 = vpop.f32.mrb[3].mxu1 }
 0x164   :  { %435 = vst [vmem:[%s1277_s8 + $0x10] sm:$0xff] %v359_v40  ;;  %v594_v42 = vmul.f32 %v1027_v61, %v359_v40 }
 0x165   :  { %v611_v43 = vadd.f32 %v595_v39, %v561_v38 }
 0x166   :  { %v610_v44 = vadd.f32 %v594_v42, %v560_v41 }
 0x167   :  { %628 = vst [vmem:[%s1278_s9 + $0x18] sm:$0xff] %v611_v43 }
 0x168   :  { %627 = vst [vmem:[%s1278_s9 + $0x10] sm:$0xff] %v610_v44 }
 0x16a   :  { %v789_v45 = vpop.f32.mrb[4].mxu1 }
 0x16b   :  { %438 = vst [vmem:[%s1277_s8 + $0x28] sm:$0xff] %v789_v45  ;;  %v597_v47 = vmul.f32 %v789_v45, %v1027_v61  ;;  %v369_v48 = vpop.f32.mrb[5].mxu1 }
 0x16c   :  { %437 = vst [vmem:[%s1277_s8 + $0x20] sm:$0xff] %v369_v48  ;;  %v596_v50 = vmul.f32 %v1027_v61, %v369_v48 }
 0x16d   :  { %v613_v51 = vadd.f32 %v597_v47, %v563_v46 }
 0x16e   :  { %v612_v52 = vadd.f32 %v596_v50, %v562_v49 }
 0x16f   :  { %630 = vst [vmem:[%s1278_s9 + $0x28] sm:$0xff] %v613_v51 }
 0x170   :  { %629 = vst [vmem:[%s1278_s9 + $0x20] sm:$0xff] %v612_v52 }
 0x172   :  { %v792_v53 = vpop.f32.mrb[6].mxu1 }
 0x173   :  { %440 = vst [vmem:[%s1277_s8 + $0x38] sm:$0xff] %v792_v53  ;;  %v599_v55 = vmul.f32 %v792_v53, %v1027_v61  ;;  %v379_v56 = vpop.f32.mrb[7].mxu1 }
 0x174   :  { %439 = vst [vmem:[%s1277_s8 + $0x30] sm:$0xff] %v379_v56  ;;  %v598_v58 = vmul.f32 %v1027_v61, %v379_v56 }
 0x175   :  { %v615_v59 = vadd.f32 %v599_v55, %v565_v54 }
 0x176   :  { %v614_v60 = vadd.f32 %v598_v58, %v564_v57 }
 0x177   :  { %632 = vst [vmem:[%s1278_s9 + $0x38] sm:$0xff] %v615_v59 }
 0x178   :  { %631 = vst [vmem:[%s1278_s9 + $0x30] sm:$0xff] %v614_v60 }
 0x17a   :  { %v795_v62 = vpop.f32.mrb[8].mxu1 }
 0x17b   :  { %442 = vst [vmem:[%s1277_s8 + $0x48] sm:$0xff] %v795_v62  ;;  %v601_v0 = vmul.f32 %v795_v62, %v1027_v61  ;;  %v389_v1 = vpop.f32.mrb[9].mxu1 }
 0x17c   :  { %441 = vst [vmem:[%s1277_s8 + $0x40] sm:$0xff] %v389_v1  ;;  %v600_v3 = vmul.f32 %v1027_v61, %v389_v1 }
 0x17d   :  { %v617_v4 = vadd.f32 %v601_v0, %v567_v63 }
 0x17e   :  { %v616_v5 = vadd.f32 %v600_v3, %v566_v2 }
 0x17f   :  { %634 = vst [vmem:[%s1278_s9 + $0x48] sm:$0xff] %v617_v4 }
 0x180   :  { %633 = vst [vmem:[%s1278_s9 + $0x40] sm:$0xff] %v616_v5 }
 0x182   :  { %v798_v6 = vpop.f32.mrb[10].mxu1 }
 0x183   :  { %444 = vst [vmem:[%s1277_s8 + $0x58] sm:$0xff] %v798_v6  ;;  %v603_v8 = vmul.f32 %v798_v6, %v1027_v61  ;;  %v399_v9 = vpop.f32.mrb[11].mxu1 }
 0x184   :  { %443 = vst [vmem:[%s1277_s8 + $0x50] sm:$0xff] %v399_v9  ;;  %v602_v11 = vmul.f32 %v1027_v61, %v399_v9 }
 0x185   :  { %v619_v12 = vadd.f32 %v603_v8, %v569_v7 }
 0x186   :  { %v618_v13 = vadd.f32 %v602_v11, %v568_v10 }
 0x187   :  { %636 = vst [vmem:[%s1278_s9 + $0x58] sm:$0xff] %v619_v12 }
 0x188   :  { %635 = vst [vmem:[%s1278_s9 + $0x50] sm:$0xff] %v618_v13 }
 0x18a   :  { %v801_v14 = vpop.f32.mrb[12].mxu1 }
 0x18b   :  { %446 = vst [vmem:[%s1277_s8 + $0x68] sm:$0xff] %v801_v14  ;;  %v605_v16 = vmul.f32 %v801_v14, %v1027_v61  ;;  %v409_v17 = vpop.f32.mrb[13].mxu1 }
 0x18c   :  { %445 = vst [vmem:[%s1277_s8 + $0x60] sm:$0xff] %v409_v17  ;;  %v604_v19 = vmul.f32 %v1027_v61, %v409_v17 }
 0x18d   :  { %v621_v20 = vadd.f32 %v605_v16, %v571_v15 }
 0x18e   :  { %v620_v21 = vadd.f32 %v604_v19, %v570_v18 }
 0x18f   :  { %638 = vst [vmem:[%s1278_s9 + $0x68] sm:$0xff] %v621_v20 }
 0x190   :  { %637 = vst [vmem:[%s1278_s9 + $0x60] sm:$0xff] %v620_v21 }
 0x192   :  { %v804_v22 = vpop.f32.mrb[14].mxu1 }
 0x193   :  { %448 = vst [vmem:[%s1277_s8 + $0x78] sm:$0xff] %v804_v22  ;;  %v607_v24 = vmul.f32 %v804_v22, %v1027_v61  ;;  %v419_v25 = vpop.f32.mrb[15].mxu1 }
 0x194   :  { %447 = vst [vmem:[%s1277_s8 + $0x70] sm:$0xff] %v419_v25  ;;  %v606_v27 = vmul.f32 %v1027_v61, %v419_v25 }
 0x195   :  { %v623_v28 = vadd.f32 %v607_v24, %v573_v23 }
 0x196   :  { %v622_v29 = vadd.f32 %v606_v27, %v572_v26 }
 0x197   :  { %640 = vst [vmem:[%s1278_s9 + $0x78] sm:$0xff] %v623_v28 }
 0x198   :  { %639 = vst [vmem:[%s1278_s9 + $0x70] sm:$0xff] %v622_v29 }

// kernel: scbig_forward.5
= control target key start
LH: loop header
LB: loop body
LE: loop exit
PB: predicated region body
PF: predicated region fallthrough
CT: control target
= control target key end

     0   :  { %16 = vsyncpa [#allocation6], 0  ;;  %s1309_s0 = inlined_call_operand.<no memory space> [shape: f32[1], index: 0, kind: input, shape index: {}]   ;;  %s1310_s1 = inlined_call_operand.vmem [shape: f32[64,128], index: 1, kind: input, shape index: {}]   ;;  %s1311_s2 = inlined_call_operand.vmem [shape: f32[128,128], index: 2, kind: input, shape index: {}]   ;;  %s1312_s3 = inlined_call_operand.vmem [shape: f32[64,128], index: 3, kind: input, shape index: {}]   ;;  %s1313_s4 = inlined_call_operand.vmem [shape: f32[64,128], index: 4, kind: input, shape index: {}]   ;;  %s1314_s5 = inlined_call_operand.vmem [shape: f32[128,128], index: 5, kind: input, shape index: {}]   ;;  %s1315_s6 = inlined_call_operand.hbm [shape: f32[64,128], index: 6, kind: output, shape index: {0}]   ;;  %s1316_s7 = inlined_call_operand.vmem [shape: f32[64,128], index: 7, kind: output, shape index: {1}]   ;;  %s1317_s8 = inlined_call_operand.hbm [shape: f32[128,128], index: 8, kind: output, shape index: {2}]   ;;  %s1318_s9 = inlined_call_operand.vmem [shape: f32[128,128], index: 9, kind: output, shape index: {3}]  }
   0x1   :  { %v41_v0 = vld [vmem:[%s1310_s1] sm:$0xff]  ;;  %v992_v1 = vld [vmem:[%s1310_s1 + $0x8] sm:$0xff]  ;;  %v198_v4 = vld [vmem:[%s1312_s3 + $0x10] sm:$0xff] }
   0x2   :  { %204 = vxpose.xlu0.b32.start [1/8] (short) %v41_v0, 128  ;;  %779 = vmatprep.mubr.f32.mxu0 %v41_v0  ;;  %v196_v2 = vld [vmem:[%s1312_s3] sm:$0xff]  ;;  %v197_v3 = vld [vmem:[%s1312_s3 + $0x8] sm:$0xff]  ;;  %v199_v5 = vld [vmem:[%s1312_s3 + $0x18] sm:$0xff] }
   0x3   :  { %v863_v6 = vpack.c.bf16 %v197_v3, %v196_v2  ;;  %v867_v7 = vpack.c.bf16 %v199_v5, %v198_v4  ;;  %v200_v8 = vld [vmem:[%s1312_s3 + $0x20] sm:$0xff]  ;;  %v201_v9 = vld [vmem:[%s1312_s3 + $0x28] sm:$0xff] }
   0x6   :  { %205 = vxpose.xlu0.b32.cont [2/8] (short) %v992_v1, 128 }
   0x7   :  { %17 = vsyncpa [#allocation8], 0  ;;  %v1016_v10 = vld [vmem:[%s1310_s1 + $0x10] sm:$0xff]  ;;  %864 = vmatprep.subr.bf16.mxu1 %v863_v6  ;;  %v871_v11 = vpack.c.bf16 %v201_v9, %v200_v8  ;;  %v203_v13 = vld [vmem:[%s1312_s3 + $0x38] sm:$0xff]  ;;  %vm236_vm0 = vcmask 523264   ;;  %v1109_v61 = vstv %s1309_s0  ;;  %s932_s11 = smov [#allocation5]  }
   0x8   :  { %866 = vmatpush3.bf16.msra.mxu1 %v863_v6  ;;  %v202_v12 = vld [vmem:[%s1312_s3 + $0x30] sm:$0xff]  ;;  %v44_v14 = vld [vmem:[%s1310_s1 + $0x18] sm:$0xff]  ;;  %v45_v16 = vld [vmem:[%s1310_s1 + $0x20] sm:$0xff]  ;;  %s648_s0 = sshll.u32 %s932_s11, 4  ;;  %s649_s0 = int_to_ptr.vmem [resolvable:$true] %s648_s0 }
   0x9   :  { %868 = vmatprep.subr.bf16.mxu1 %v867_v7  ;;  %v875_v15 = vpack.c.bf16 %v203_v13, %v202_v12  ;;  %v59_v17 = vld [vmem:[%s1311_s2] sm:$0xff]  ;;  %v60_v18 = vld [vmem:[%s1311_s2 + $0x8] sm:$0xff]  ;;  %v61_v21 = vld [vmem:[%s1311_s2 + $0x10] sm:$0xff]  ;;  %s884_s16 = scalar_lea.vmem %s649_s0, 1024  ;;  %p889_p1 = scmp.lt.s32.totalorder %s649_s0, %s649_s0 }
   0xa   :  { %206 = vxpose.xlu0.b32.cont [3/8] (short) %v1016_v10, 128  ;;  %v831_v19 = vpack.c.bf16 %v60_v18, %v59_v17  ;;  %v46_v20 = vld [vmem:[%s1310_s1 + $0x28] sm:$0xff]  ;;  %v62_v22 = vld [vmem:[%s1311_s2 + $0x18] sm:$0xff]  ;;  %v47_v24 = vld [vmem:[%s1310_s1 + $0x30] sm:$0xff]  ;;  %p885_p0 = scmp.ne.s32.totalorder %s649_s0, %s884_s16  ;;  %p890_p2 = scmp.lt.s32.totalorder %s884_s16, %s884_s16 }
   0xb   :  { %v835_v23 = vpack.c.bf16 %v62_v22, %v61_v21  ;;  %v63_v25 = vld [vmem:[%s1311_s2 + $0x20] sm:$0xff]  ;;  %v64_v26 = vld [vmem:[%s1311_s2 + $0x28] sm:$0xff]  ;;  %v48_v28 = vld [vmem:[%s1310_s1 + $0x38] sm:$0xff] }
   0xc   :  { %870 = vmatpush3.bf16.msra.mxu1 %v867_v7  ;;  %832 = vmatprep.subr.bf16.mxu0 %v831_v19  ;;  %v839_v27 = vpack.c.bf16 %v64_v26, %v63_v25  ;;  %v65_v29 = vld [vmem:[%s1311_s2 + $0x30] sm:$0xff]  ;;  %v66_v30 = vld [vmem:[%s1311_s2 + $0x38] sm:$0xff]  ;;  %v67_v32 = vld [vmem:[%s1311_s2 + $0x40] sm:$0xff]  ;;  %p891_p3 = por %p890_p2, %p889_p1 }
   0xd   :  { %872 = vmatprep.subr.bf16.mxu1 %v871_v11  ;;  %834 = vmatpush3.bf16.msra.mxu0 %v831_v19  ;;  %v843_v31 = vpack.c.bf16 %v66_v30, %v65_v29  ;;  %v68_v33 = vld [vmem:[%s1311_s2 + $0x48] sm:$0xff]  ;;  %v69_v35 = vld [vmem:[%s1311_s2 + $0x50] sm:$0xff]  ;;  %v70_v36 = vld [vmem:[%s1311_s2 + $0x58] sm:$0xff] }
   0xe   :  { %207 = vxpose.xlu0.b32.cont [4/8] (short) %v44_v14, 128  ;;  %836 = vmatprep.subr.bf16.mxu0 %v835_v23  ;;  %v847_v34 = vpack.c.bf16 %v68_v33, %v67_v32  ;;  %v851_v37 = vpack.c.bf16 %v70_v36, %v69_v35  ;;  %v71_v38 = vld [vmem:[%s1311_s2 + $0x60] sm:$0xff]  ;;  %v72_v39 = vld [vmem:[%s1311_s2 + $0x68] sm:$0xff]  ;;  %v73_v41 = vld [vmem:[%s1311_s2 + $0x70] sm:$0xff]  ;;  %p892_p4 = pnand %p891_p3, %p885_p0 }
   0xf   :  { %v855_v40 = vpack.c.bf16 %v72_v39, %v71_v38  ;;  %v74_v42 = vld [vmem:[%s1311_s2 + $0x78] sm:$0xff]  ;;  %v523_v2 = vld [vmem:[%s1313_s4] sm:$0xff]  ;;  %v528_v17 = vld [vmem:[%s1313_s4 + $0x28] sm:$0xff] }
  0x10   :  { %874 = vmatpush3.bf16.msra.mxu1 %v871_v11  ;;  %v859_v43 = vpack.c.bf16 %v74_v42, %v73_v41  ;;  %v526_v9 = vld [vmem:[%s1313_s4 + $0x18] sm:$0xff]  ;;  %v527_v18 = vld [vmem:[%s1313_s4 + $0x20] sm:$0xff]  ;;  %v529_v26 = vld [vmem:[%s1313_s4 + $0x30] sm:$0xff] }
  0x11   :  { %876 = vmatprep.subr.bf16.mxu1 %v875_v15  ;;  %838 = vmatpush3.bf16.msra.mxu0 %v835_v23  ;;  %v530_v25 = vld [vmem:[%s1313_s4 + $0x38] sm:$0xff] }
  0x12   :  { %208 = vxpose.xlu0.b32.cont [5/8] (short) %v45_v16, 128  ;;  %840 = vmatprep.subr.bf16.mxu0 %v839_v27 }
  0x14   :  { %878 = vmatpush3.bf16.msra.mxu1 %v875_v15 }
  0x15   :  { %842 = vmatpush3.bf16.msra.mxu0 %v839_v27 }
  0x16   :  { %209 = vxpose.xlu0.b32.cont [6/8] (short) %v46_v20, 128  ;;  %844 = vmatprep.subr.bf16.mxu0 %v843_v31 }
  0x19   :  { %846 = vmatpush3.bf16.msra.mxu0 %v843_v31 }
  0x1a   :  { %210 = vxpose.xlu0.b32.cont [7/8] (short) %v47_v24, 128  ;;  %848 = vmatprep.subr.bf16.mxu0 %v847_v34 }
  0x1d   :  { %850 = vmatpush3.bf16.msra.mxu0 %v847_v34 }
  0x1e   :  { %211 = vxpose.xlu0.b32.end [8/8] (short) %v48_v28, 128  ;;  %852 = vmatprep.subr.bf16.mxu0 %v851_v37 }
  0x21   :  { %854 = vmatpush3.bf16.msra.mxu0 %v851_v37 }
  0x22   :  { %856 = vmatprep.subr.bf16.mxu0 %v855_v40 }
  0x25   :  { %858 = vmatpush3.bf16.msra.mxu0 %v855_v40 }
  0x26   :  { %860 = vmatprep.subr.bf16.mxu0 %v859_v43 }
  0x29   :  { %862 = vmatpush3.bf16.msra.mxu0 %v859_v43 }
  0x2c   :  { %780 = vmatmul.mubr.f32.vlgmr.msra.gmra.mrb[0].mxu0 %v992_v1  ;;  %v524_v1 = vld [vmem:[%s1313_s4 + $0x8] sm:$0xff] }
  0x2d   :  { %782 = vmatprep.mubr.f32.mxu0 %v1016_v10  ;;  %v525_v10 = vld [vmem:[%s1313_s4 + $0x10] sm:$0xff] }
  0x30   :  { %783 = vmatmul.mubr.f32.gmra.mrb[2].mxu0 %v44_v14 }
  0x31   :  { %785 = vmatprep.mubr.f32.mxu0 %v45_v16 }
  0x34   :  { %786 = vmatmul.mubr.f32.gmra.mrb[4].mxu0 %v46_v20 }
  0x35   :  { %788 = vmatprep.mubr.f32.mxu0 %v47_v24 }
  0x38   :  { %789 = vmatmul.mubr.f32.gmra.mrb[6].mxu0 %v48_v28 }
  0x82   :  { %v220_v44 = vpop.trf.xlu0 }
  0x83   :  { %807 = vmatprep.mubr.msk.f32.mxu1 %vm236_vm0, %v220_v44 }
  0x86   :  { %v221_v45 = vpop.trf.xlu0 }
  0x87   :  { %808 = vmatmul.mubr.msk.f32.vlgmr.msra.gmra.mrb[0].mxu1 %vm236_vm0, %v221_v45 }
  0x8a   :  { %v222_v46 = vpop.trf.xlu0 }
  0x8b   :  { %810 = vmatprep.mubr.msk.f32.mxu1 %vm236_vm0, %v222_v46 }
  0x8e   :  { %v223_v47 = vpop.trf.xlu0 }
  0x8f   :  { %811 = vmatmul.mubr.msk.f32.gmra.mrb[2].mxu1 %vm236_vm0, %v223_v47 }
  0x92   :  { %v224_v48 = vpop.trf.xlu0 }
  0x93   :  { %813 = vmatprep.mubr.msk.f32.mxu1 %vm236_vm0, %v224_v48 }
  0x96   :  { %v225_v49 = vpop.trf.xlu0 }
  0x97   :  { %814 = vmatmul.mubr.msk.f32.gmra.mrb[4].mxu1 %vm236_vm0, %v225_v49 }
  0x9a   :  { %v226_v50 = vpop.trf.xlu0 }
  0x9b   :  { %816 = vmatprep.mubr.msk.f32.mxu1 %vm236_vm0, %v226_v50 }
  0x9e   :  { %v227_v51 = vpop.trf.xlu0 }
  0x9f   :  { %817 = vmatmul.mubr.msk.f32.gmra.mrb[6].mxu1 %vm236_vm0, %v227_v51 }
  0xa2   :  { %v228_v52 = vpop.trf.xlu0 }
  0xa3   :  { %819 = vmatprep.mubr.msk.f32.mxu1 %vm236_vm0, %v228_v52 }
  0xa6   :  { %v229_v53 = vpop.trf.xlu0 }
  0xa7   :  { %820 = vmatmul.mubr.msk.f32.gmra.mrb[8].mxu1 %vm236_vm0, %v229_v53 }
  0xaa   :  { %v230_v54 = vpop.trf.xlu0 }
  0xab   :  { %822 = vmatprep.mubr.msk.f32.mxu1 %vm236_vm0, %v230_v54 }
  0xae   :  { %v231_v55 = vpop.trf.xlu0 }
  0xaf   :  { %823 = vmatmul.mubr.msk.f32.gmra.mrb[10].mxu1 %vm236_vm0, %v231_v55 }
  0xb2   :  { %v232_v56 = vpop.trf.xlu0 }
  0xb3   :  { %825 = vmatprep.mubr.msk.f32.mxu1 %vm236_vm0, %v232_v56 }
  0xb6   :  { %v233_v57 = vpop.trf.xlu0 }
  0xb7   :  { %826 = vmatmul.mubr.msk.f32.gmra.mrb[12].mxu1 %vm236_vm0, %v233_v57 }
  0xba   :  { %v234_v58 = vpop.trf.xlu0 }
  0xbb   :  { %828 = vmatprep.mubr.msk.f32.mxu1 %vm236_vm0, %v234_v58 }
  0xbe   :  { %v235_v59 = vpop.trf.xlu0 }
  0xbf   :  { %829 = vmatmul.mubr.msk.f32.gmra.mrb[14].mxu1 %vm236_vm0, %v235_v59 }
  0xff   :  { %v781_v60 = vpop.f32.mrb[0].mxu0 }
 0x100   :  { %516 = vst [vmem:[#allocation5 + $0x8] sm:$0xff] %v781_v60  ;;  %v141_v62 = vpop.f32.mrb[1].mxu0  ;;  %v533_v63 = vmul.f32 %v781_v60, %v1109_v61 }
 0x101   :  { %515 = vst [vmem:[#allocation5] sm:$0xff] %v141_v62  ;;  %v532_v0 = vmul.f32 %v1109_v61, %v141_v62 }
 0x102   :  { %v541_v3 = vadd.f32 %v533_v63, %v524_v1 }
 0x103   :  { %v540_v4 = vadd.f32 %v532_v0, %v523_v2  ;;  %v784_v5 = vpop.f32.mrb[2].mxu0 }
 0x104   :  { %518 = vst [vmem:[#allocation5 + $0x18] sm:$0xff] %v784_v5  ;;  %v151_v6 = vpop.f32.mrb[3].mxu0  ;;  %549 = vst [vmem:[%s1316_s7 + $0x8] sm:$0xff] %v541_v3  ;;  %v535_v7 = vmul.f32 %v784_v5, %v1109_v61 }
 0x105   :  { %548 = vst [vmem:[%s1316_s7] sm:$0xff] %v540_v4  ;;  %517 = vst [vmem:[#allocation5 + $0x10] sm:$0xff] %v151_v6  ;;  %v534_v8 = vmul.f32 %v1109_v61, %v151_v6 }
 0x106   :  { %v543_v11 = vadd.f32 %v535_v7, %v526_v9 }
 0x107   :  { %v542_v12 = vadd.f32 %v534_v8, %v525_v10  ;;  %v787_v13 = vpop.f32.mrb[4].mxu0 }
 0x108   :  { %520 = vst [vmem:[#allocation5 + $0x28] sm:$0xff] %v787_v13  ;;  %v161_v14 = vpop.f32.mrb[5].mxu0  ;;  %551 = vst [vmem:[%s1316_s7 + $0x18] sm:$0xff] %v543_v11  ;;  %v537_v15 = vmul.f32 %v787_v13, %v1109_v61 }
 0x109   :  { %550 = vst [vmem:[%s1316_s7 + $0x10] sm:$0xff] %v542_v12  ;;  %519 = vst [vmem:[#allocation5 + $0x20] sm:$0xff] %v161_v14  ;;  %v536_v16 = vmul.f32 %v1109_v61, %v161_v14 }
 0x10a   :  { %v545_v19 = vadd.f32 %v537_v15, %v528_v17 }
 0x10b   :  { %v544_v20 = vadd.f32 %v536_v16, %v527_v18  ;;  %v790_v21 = vpop.f32.mrb[6].mxu0 }
 0x10c   :  { %522 = vst [vmem:[#allocation5 + $0x38] sm:$0xff] %v790_v21  ;;  %v171_v22 = vpop.f32.mrb[7].mxu0  ;;  %553 = vst [vmem:[%s1316_s7 + $0x28] sm:$0xff] %v545_v19  ;;  %v539_v23 = vmul.f32 %v790_v21, %v1109_v61 }
 0x10d   :  { %552 = vst [vmem:[%s1316_s7 + $0x20] sm:$0xff] %v544_v20  ;;  %521 = vst [vmem:[#allocation5 + $0x30] sm:$0xff] %v171_v22  ;;  %v538_v24 = vmul.f32 %v1109_v61, %v171_v22 }
 0x10e   :  { %v547_v27 = vadd.f32 %v539_v23, %v530_v25 }
 0x10f   :  { %v546_v28 = vadd.f32 %v538_v24, %v529_v26 }
 0x110   :  { %555 = vst [vmem:[%s1316_s7 + $0x38] sm:$0xff] %v547_v27 }
 0x111   :  { %554 = vst [vmem:[%s1316_s7 + $0x30] sm:$0xff] %v546_v28 }
 0x112   :  { %895 = shalt.err (!%p892_p4)
}
 0x113   :  { %s896_s1 = scalar_lea.hbm %s1315_s6, 1024 }
 0x114   :  { %p897_p5 = scmp.ne.s32.totalorder %s1315_s6, %s896_s1  ;;  %p900_p6 = scmp.lt.u32.totalorder %s896_s1, %s1315_s6 }
 0x116   :  { %p902_p7 = pnand %p900_p6, %p897_p5 }
 0x118   :  { %905 = shalt.err (!%p902_p7)
}
 0x119   :  { %s933_s7 = smov 128   ;;  %s934_s21 = smov 8   ;;  %v561_v30 = vld [vmem:[%s1314_s5 + $0x8] sm:$0xff]  ;;  %v560_v33 = vld [vmem:[%s1314_s5] sm:$0xff]  ;;  %v563_v38 = vld [vmem:[%s1314_s5 + $0x18] sm:$0xff] }
 0x11a   :  { %654 = dma.vmem_to_hbm [thread:$0]  %s649_s0, 1024, %s1315_s6, [#allocation6], %s933_s7, %s933_s7, %s934_s21  }
 0x11b   :  { %v562_v41 = vld [vmem:[%s1314_s5 + $0x10] sm:$0xff]  ;;  %v565_v46 = vld [vmem:[%s1314_s5 + $0x28] sm:$0xff]  ;;  %v564_v49 = vld [vmem:[%s1314_s5 + $0x20] sm:$0xff]  ;;  %s935_s26 = smov [#allocation7]  }
 0x11c   :  { %v567_v54 = vld [vmem:[%s1314_s5 + $0x38] sm:$0xff]  ;;  %v566_v57 = vld [vmem:[%s1314_s5 + $0x30] sm:$0xff]  ;;  %v569_v63 = vld [vmem:[%s1314_s5 + $0x48] sm:$0xff]  ;;  %s662_s27 = sshll.u32 %s935_s26, 4  ;;  %s663_s27 = int_to_ptr.vmem [resolvable:$true] %s662_s27 }
 0x11d   :  { %v568_v2 = vld [vmem:[%s1314_s5 + $0x40] sm:$0xff]  ;;  %v571_v7 = vld [vmem:[%s1314_s5 + $0x58] sm:$0xff]  ;;  %v570_v10 = vld [vmem:[%s1314_s5 + $0x50] sm:$0xff]  ;;  %s906_s11 = scalar_lea.vmem %s663_s27, 2048  ;;  %p911_p9 = scmp.lt.s32.totalorder %s663_s27, %s663_s27 }
 0x11e   :  { %v573_v15 = vld [vmem:[%s1314_s5 + $0x68] sm:$0xff]  ;;  %v572_v18 = vld [vmem:[%s1314_s5 + $0x60] sm:$0xff]  ;;  %v575_v23 = vld [vmem:[%s1314_s5 + $0x78] sm:$0xff]  ;;  %p907_p8 = scmp.ne.s32.totalorder %s663_s27, %s906_s11  ;;  %p912_p10 = scmp.lt.s32.totalorder %s906_s11, %s906_s11 }
 0x11f   :  { %v574_v26 = vld [vmem:[%s1314_s5 + $0x70] sm:$0xff] }
 0x120   :  { %p913_p11 = por %p912_p10, %p911_p9 }
 0x122   :  { %p914_p12 = pnand %p913_p11, %p907_p8 }
 0x15a   :  { %v809_v29 = vpop.f32.mrb[0].mxu1 }
 0x15b   :  { %436 = vst [vmem:[#allocation7 + $0x8] sm:$0xff] %v809_v29  ;;  %v595_v31 = vmul.f32 %v809_v29, %v1109_v61  ;;  %v351_v32 = vpop.f32.mrb[1].mxu1 }
 0x15c   :  { %435 = vst [vmem:[#allocation7] sm:$0xff] %v351_v32  ;;  %v594_v34 = vmul.f32 %v1109_v61, %v351_v32 }
 0x15d   :  { %v611_v35 = vadd.f32 %v595_v31, %v561_v30 }
 0x15e   :  { %v610_v36 = vadd.f32 %v594_v34, %v560_v33 }
 0x15f   :  { %628 = vst [vmem:[%s1318_s9 + $0x8] sm:$0xff] %v611_v35 }
 0x160   :  { %627 = vst [vmem:[%s1318_s9] sm:$0xff] %v610_v36 }
 0x162   :  { %v812_v37 = vpop.f32.mrb[2].mxu1 }
 0x163   :  { %438 = vst [vmem:[#allocation7 + $0x18] sm:$0xff] %v812_v37  ;;  %v597_v39 = vmul.f32 %v812_v37, %v1109_v61  ;;  %v361_v40 = vpop.f32.mrb[3].mxu1 }
 0x164   :  { %437 = vst [vmem:[#allocation7 + $0x10] sm:$0xff] %v361_v40  ;;  %v596_v42 = vmul.f32 %v1109_v61, %v361_v40 }
 0x165   :  { %v613_v43 = vadd.f32 %v597_v39, %v563_v38 }
 0x166   :  { %v612_v44 = vadd.f32 %v596_v42, %v562_v41 }
 0x167   :  { %630 = vst [vmem:[%s1318_s9 + $0x18] sm:$0xff] %v613_v43 }
 0x168   :  { %629 = vst [vmem:[%s1318_s9 + $0x10] sm:$0xff] %v612_v44 }
 0x16a   :  { %v815_v45 = vpop.f32.mrb[4].mxu1 }
 0x16b   :  { %440 = vst [vmem:[#allocation7 + $0x28] sm:$0xff] %v815_v45  ;;  %v599_v47 = vmul.f32 %v815_v45, %v1109_v61  ;;  %v371_v48 = vpop.f32.mrb[5].mxu1 }
 0x16c   :  { %439 = vst [vmem:[#allocation7 + $0x20] sm:$0xff] %v371_v48  ;;  %v598_v50 = vmul.f32 %v1109_v61, %v371_v48 }
 0x16d   :  { %v615_v51 = vadd.f32 %v599_v47, %v565_v46 }
 0x16e   :  { %v614_v52 = vadd.f32 %v598_v50, %v564_v49 }
 0x16f   :  { %632 = vst [vmem:[%s1318_s9 + $0x28] sm:$0xff] %v615_v51 }
 0x170   :  { %631 = vst [vmem:[%s1318_s9 + $0x20] sm:$0xff] %v614_v52 }
 0x172   :  { %v818_v53 = vpop.f32.mrb[6].mxu1 }
 0x173   :  { %442 = vst [vmem:[#allocation7 + $0x38] sm:$0xff] %v818_v53  ;;  %v601_v55 = vmul.f32 %v818_v53, %v1109_v61  ;;  %v381_v56 = vpop.f32.mrb[7].mxu1 }
 0x174   :  { %441 = vst [vmem:[#allocation7 + $0x30] sm:$0xff] %v381_v56  ;;  %v600_v58 = vmul.f32 %v1109_v61, %v381_v56 }
 0x175   :  { %v617_v59 = vadd.f32 %v601_v55, %v567_v54 }
 0x176   :  { %v616_v60 = vadd.f32 %v600_v58, %v566_v57 }
 0x177   :  { %634 = vst [vmem:[%s1318_s9 + $0x38] sm:$0xff] %v617_v59 }
 0x178   :  { %633 = vst [vmem:[%s1318_s9 + $0x30] sm:$0xff] %v616_v60 }
 0x17a   :  { %v821_v62 = vpop.f32.mrb[8].mxu1 }
 0x17b   :  { %444 = vst [vmem:[#allocation7 + $0x48] sm:$0xff] %v821_v62  ;;  %v603_v0 = vmul.f32 %v821_v62, %v1109_v61  ;;  %v391_v1 = vpop.f32.mrb[9].mxu1 }
 0x17c   :  { %443 = vst [vmem:[#allocation7 + $0x40] sm:$0xff] %v391_v1  ;;  %v602_v3 = vmul.f32 %v1109_v61, %v391_v1 }
 0x17d   :  { %v619_v4 = vadd.f32 %v603_v0, %v569_v63 }
 0x17e   :  { %v618_v5 = vadd.f32 %v602_v3, %v568_v2 }
 0x17f   :  { %636 = vst [vmem:[%s1318_s9 + $0x48] sm:$0xff] %v619_v4 }
 0x180   :  { %635 = vst [vmem:[%s1318_s9 + $0x40] sm:$0xff] %v618_v5 }
 0x182   :  { %v824_v6 = vpop.f32.mrb[10].mxu1 }
 0x183   :  { %446 = vst [vmem:[#allocation7 + $0x58] sm:$0xff] %v824_v6  ;;  %v605_v8 = vmul.f32 %v824_v6, %v1109_v61  ;;  %v401_v9 = vpop.f32.mrb[11].mxu1 }
 0x184   :  { %445 = vst [vmem:[#allocation7 + $0x50] sm:$0xff] %v401_v9  ;;  %v604_v11 = vmul.f32 %v1109_v61, %v401_v9 }
 0x185   :  { %v621_v12 = vadd.f32 %v605_v8, %v571_v7 }
 0x186   :  { %v620_v13 = vadd.f32 %v604_v11, %v570_v10 }
 0x187   :  { %638 = vst [vmem:[%s1318_s9 + $0x58] sm:$0xff] %v621_v12 }
 0x188   :  { %637 = vst [vmem:[%s1318_s9 + $0x50] sm:$0xff] %v620_v13 }
 0x18a   :  { %v827_v14 = vpop.f32.mrb[12].mxu1 }
 0x18b   :  { %448 = vst [vmem:[#allocation7 + $0x68] sm:$0xff] %v827_v14  ;;  %v607_v16 = vmul.f32 %v827_v14, %v1109_v61  ;;  %v411_v17 = vpop.f32.mrb[13].mxu1 }
 0x18c   :  { %447 = vst [vmem:[#allocation7 + $0x60] sm:$0xff] %v411_v17  ;;  %v606_v19 = vmul.f32 %v1109_v61, %v411_v17 }
 0x18d   :  { %v623_v20 = vadd.f32 %v607_v16, %v573_v15 }
 0x18e   :  { %v622_v21 = vadd.f32 %v606_v19, %v572_v18 }
 0x18f   :  { %640 = vst [vmem:[%s1318_s9 + $0x68] sm:$0xff] %v623_v20 }
 0x190   :  { %639 = vst [vmem:[%s1318_s9 + $0x60] sm:$0xff] %v622_v21 }
 0x192   :  { %v830_v22 = vpop.f32.mrb[14].mxu1 }
 0x193   :  { %450 = vst [vmem:[#allocation7 + $0x78] sm:$0xff] %v830_v22  ;;  %v609_v24 = vmul.f32 %v830_v22, %v1109_v61  ;;  %v421_v25 = vpop.f32.mrb[15].mxu1 }
 0x194   :  { %449 = vst [vmem:[#allocation7 + $0x70] sm:$0xff] %v421_v25  ;;  %v608_v27 = vmul.f32 %v1109_v61, %v421_v25 }
 0x195   :  { %v625_v28 = vadd.f32 %v609_v24, %v575_v23 }
 0x196   :  { %917 = shalt.err (!%p914_p12)
}
 0x197   :  { %s918_s13 = scalar_lea.hbm %s1317_s8, 2048 }
 0x198   :  { %p919_p13 = scmp.ne.s32.totalorder %s1317_s8, %s918_s13  ;;  %p922_p0 = scmp.lt.u32.totalorder %s918_s13, %s1317_s8 }
 0x19a   :  { %p924_p1 = pnand %p922_p0, %p919_p13 }
 0x19c   :  { %927 = shalt.err (!%p924_p1)
}
 0x19d   :  { %668 = dma.vmem_to_hbm [thread:$0]  %s663_s27, 2048, %s1317_s8, [#allocation8], %s933_s7, %s933_s7, %s934_s21   ;;  %v624_v61 = vadd.f32 %v608_v27, %v574_v26 }
 0x19e   :  { %642 = vst [vmem:[%s1318_s9 + $0x78] sm:$0xff] %v625_v28 }
 0x19f   :  { %641 = vst [vmem:[%s1318_s9 + $0x70] sm:$0xff] %v624_v61 }
 0x1a0   :  { %928 = dma.done.wait [#allocation6], 1024  }
 0x1a1   :  { %929 = vsyncadd [#allocation6], 4294966272 }
 0x1a2   :  { %930 = dma.done.wait [#allocation8], 2048  }
 0x1a3   :  { %931 = vsyncadd [#allocation8], 4294965248 }
 0x1a4   :  { %681 = vsyncpa [#allocation6], 1 }
 0x1a5   :  { %682 = vsyncpa [#allocation8], 1 }

</bundles_post_ra>
